<compile_context>
chip_gen: v6e
topology: v6e:2x2x1
jax: 0.10.0
libtpu: 0.0.40
codegen_flags: <defaults>
</compile_context>

<pallas_src>
import functools

import jax
import jax.numpy as jnp
from jax.experimental import pallas as pl
from jax.experimental.pallas import tpu as pltpu


# ---------------------------------------------------------------------------
# Bidirectional LSTM layer kernel (both directions fused, grid over time).
# ---------------------------------------------------------------------------
def _make_bilstm_kernel(hidden):
    H = hidden

    def kernel(xf_ref, xb_ref,
               wih_f_ref, whh_f_ref, b_f_ref,
               wih_b_ref, whh_b_ref, b_b_ref,
               outf_ref, outb_ref,
               hf_ref, cf_ref, hb_ref, cb_ref):
        t = pl.program_id(0)

        @pl.when(t == 0)
        def _():
            hf_ref[...] = jnp.zeros_like(hf_ref)
            cf_ref[...] = jnp.zeros_like(cf_ref)
            hb_ref[...] = jnp.zeros_like(hb_ref)
            cb_ref[...] = jnp.zeros_like(cb_ref)

        def cell(x_t, wih_ref, whh_ref, b_ref, h_ref, c_ref, out_ref):
            h = h_ref[...]
            c = c_ref[...]
            gates = (jnp.dot(x_t, wih_ref[...],
                             preferred_element_type=jnp.float32)
                     + jnp.dot(h, whh_ref[...],
                               preferred_element_type=jnp.float32)
                     + b_ref[...])                               # (B, 4H)
            # PyTorch gate order: i, f, g, o
            i_g = jax.nn.sigmoid(gates[:, 0 * H:1 * H])
            f_g = jax.nn.sigmoid(gates[:, 1 * H:2 * H])
            g_g = jnp.tanh(gates[:, 2 * H:3 * H])
            o_g = jax.nn.sigmoid(gates[:, 3 * H:4 * H])
            c_new = f_g * c + i_g * g_g
            h_new = o_g * jnp.tanh(c_new)
            h_ref[...] = h_new
            c_ref[...] = c_new
            out_ref[0] = h_new.astype(out_ref.dtype)

        # forward direction sees timestep t, backward sees S-1-t (via specs)
        cell(xf_ref[0].astype(jnp.float32), wih_f_ref, whh_f_ref, b_f_ref,
             hf_ref, cf_ref, outf_ref)
        cell(xb_ref[0].astype(jnp.float32), wih_b_ref, whh_b_ref, b_b_ref,
             hb_ref, cb_ref, outb_ref)

    return kernel


def bilstm_layer(x_tm, layer_params, hidden):
    """x_tm: (S, B, D) time-major. Returns (S, B, 2*hidden) time-major."""
    S, B, D = x_tm.shape
    H = hidden
    wih_f, whh_f, b_f, wih_b, whh_b, b_b = layer_params

    # Pad the feature (contraction) dim to a multiple of 8; the padded rows of
    # W_ih are zero so the math is unchanged.
    pad = (-D) % 8
    if pad:
        x_tm = jnp.pad(x_tm, ((0, 0), (0, 0), (0, pad)))
        wih_f = jnp.pad(wih_f, ((0, pad), (0, 0)))
        wih_b = jnp.pad(wih_b, ((0, pad), (0, 0)))
        D += pad

    w_spec_ih = pl.BlockSpec((D, 4 * H), lambda t: (0, 0))
    w_spec_hh = pl.BlockSpec((H, 4 * H), lambda t: (0, 0))
    b_spec = pl.BlockSpec((1, 4 * H), lambda t: (0, 0))

    outf, outb = pl.pallas_call(
        _make_bilstm_kernel(H),
        out_shape=(jax.ShapeDtypeStruct((S, B, H), jnp.float32),
                   jax.ShapeDtypeStruct((S, B, H), jnp.float32)),
        grid_spec=pltpu.PrefetchScalarGridSpec(
            num_scalar_prefetch=0,
            grid=(S,),
            in_specs=[
                pl.BlockSpec((1, B, D), lambda t: (t, 0, 0)),          # fwd x_t
                pl.BlockSpec((1, B, D), lambda t: (S - 1 - t, 0, 0)),  # bwd x_t
                w_spec_ih, w_spec_hh, b_spec,
                w_spec_ih, w_spec_hh, b_spec,
            ],
            out_specs=[
                pl.BlockSpec((1, B, H), lambda t: (t, 0, 0)),
                pl.BlockSpec((1, B, H), lambda t: (S - 1 - t, 0, 0)),
            ],
            scratch_shapes=[pltpu.VMEM((B, H), jnp.float32)] * 4,
        ),
        compiler_params=pltpu.CompilerParams(
            dimension_semantics=("arbitrary",)),   # sequential recurrence
    )(x_tm, x_tm, wih_f, whh_f, b_f, wih_b, whh_b, b_b)

    return jnp.concatenate([outf, outb], axis=-1)


# ---------------------------------------------------------------------------
# Attention pooling + final FC kernel (batched over TB batch rows per step).
# ---------------------------------------------------------------------------
def attn_fc_kernel(x_ref, wa_ref, ba_ref, wf_ref, bf_ref, o_ref):
    # x_ref : (TB, S, H2) LSTM output block for TB batch rows
    # wa_ref: (1, H2)     attention Linear weight (row layout, no transpose)
    # ba_ref: (1, 1)      attention Linear bias
    # wf_ref: (1, H2)     final fc weight (row layout)
    # bf_ref: (1, 1)      final fc bias
    # o_ref : (TB, 1)     model output
    x = x_ref[...].astype(jnp.float32)                 # single f32 cast
    wa = wa_ref[...].astype(jnp.float32)               # (1, H2)

    # attention scores, lane-dense (TB, S): VPU multiply + last-axis reduce
    s = jnp.sum(x * wa, axis=-1) + ba_ref[...]         # (TB, S)

    # softmax over the sequence (last) axis
    m = jnp.max(s, axis=-1, keepdims=True)
    e = jnp.exp(s - m)
    p = e / jnp.sum(e, axis=-1, keepdims=True)         # (TB, S)

    # context = sum over seq of x * p  -> (TB, H2)
    ctx = jnp.sum(x * p[:, :, None], axis=1)

    # dropout is identity in eval mode
    # TODO(synk): training-mode dropout would use pltpu.prng_seed/prng_random_bits
    wf = wf_ref[...].astype(jnp.float32)               # (1, H2)
    out = jnp.sum(ctx * wf, axis=-1, keepdims=True) + bf_ref[...]   # (TB, 1)
    o_ref[...] = out.astype(o_ref.dtype)


def attention_fc(out_bm, attn_w, attn_b, fc_w, fc_b):
    """out_bm: (B, S, H2) batch-major LSTM output. Returns (B, 1)."""
    B, S, H2 = out_bm.shape

    # batch rows per grid step: largest sublane-aligned divisor of B (else B)
    TB = B
    for cand in (128, 64, 32, 16, 8):
        if B % cand == 0:
            TB = cand
            break

    return pl.pallas_call(
        attn_fc_kernel,
        out_shape=jax.ShapeDtypeStruct((B, 1), jnp.float32),
        grid_spec=pltpu.PrefetchScalarGridSpec(
            num_scalar_prefetch=0,
            grid=(B // TB,),
            in_specs=[
                pl.BlockSpec((TB, S, H2), lambda i: (i, 0, 0)),
                pl.BlockSpec((1, H2), lambda i: (0, 0)),
                pl.BlockSpec((1, 1), lambda i: (0, 0)),
                pl.BlockSpec((1, H2), lambda i: (0, 0)),
                pl.BlockSpec((1, 1), lambda i: (0, 0)),
            ],
            out_specs=pl.BlockSpec((TB, 1), lambda i: (i, 0)),
        ),
        compiler_params=pltpu.CompilerParams(
            dimension_semantics=("parallel",)),
    )(out_bm,
      attn_w.astype(jnp.float32),
      attn_b.reshape(1, 1).astype(jnp.float32),
      fc_w.astype(jnp.float32),
      fc_b.reshape(1, 1).astype(jnp.float32))


# ---------------------------------------------------------------------------
# Full StockLSTM forward (Pallas) and pure-JAX reference.
# ---------------------------------------------------------------------------
def stock_lstm_forward(x, params, hidden, num_layers):
    """x: (B, S, input_dim) batch-first, like the PyTorch module."""
    xt = jnp.transpose(x, (1, 0, 2)).astype(jnp.float32)      # (S, B, D) time-major
    for layer in range(num_layers):
        xt = bilstm_layer(xt, params["lstm"][layer], hidden)  # (S, B, 2H)
    out_bm = jnp.transpose(xt, (1, 0, 2))                     # (B, S, 2H)
    return attention_fc(out_bm, params["attn_w"], params["attn_b"],
                        params["fc_w"], params["fc_b"])


def _lstm_scan_ref(x_tm, wih, whh, b, H):
    B = x_tm.shape[1]

    def step(carry, x_t):
        h, c = carry
        gates = x_t @ wih + h @ whh + b
        i_g = jax.nn.sigmoid(gates[:, :H])
        f_g = jax.nn.sigmoid(gates[:, H:2 * H])
        g_g = jnp.tanh(gates[:, 2 * H:3 * H])
        o_g = jax.nn.sigmoid(gates[:, 3 * H:])
        c = f_g * c + i_g * g_g
        h = o_g * jnp.tanh(c)
        return (h, c), h

    init = (jnp.zeros((B, H), jnp.float32), jnp.zeros((B, H), jnp.float32))
    _, hs = jax.lax.scan(step, init, x_tm)
    return hs                                                  # (S, B, H)


def stock_lstm_ref(x, params, hidden, num_layers):
    H = hidden
    xt = jnp.transpose(x, (1, 0, 2)).astype(jnp.float32)
    for layer in range(num_layers):
        wih_f, whh_f, b_f, wih_b, whh_b, b_b = params["lstm"][layer]
        hf = _lstm_scan_ref(xt, wih_f, whh_f, b_f, H)
        hb = _lstm_scan_ref(xt[::-1], wih_b, whh_b, b_b, H)[::-1]
        xt = jnp.concatenate([hf, hb], axis=-1)
    out = jnp.transpose(xt, (1, 0, 2))                                     # (B, S, 2H)
    scores = jnp.einsum("bsh,oh->bso", out, params["attn_w"]) + params["attn_b"]
    p = jax.nn.softmax(scores, axis=1)                                     # (B, S, 1)
    ctx = jnp.sum(out * p, axis=1)                                         # (B, 2H)
    return jnp.einsum("bh,oh->bo", ctx, params["fc_w"]) + params["fc_b"]   # (B, 1)


def init_params(key, input_dim, hidden, num_layers):
    H = hidden
    params = {"lstm": []}
    d_in = input_dim
    for _ in range(num_layers):
        key, *ks = jax.random.split(key, 7)
        bound = 1.0 / (H ** 0.5)

        def u(k, shape):
            return jax.random.uniform(k, shape, jnp.float32, -bound, bound)

        # weights stored pre-transposed (input-major) for the kernel's x @ W;
        # PyTorch's b_ih + b_hh are folded into a single bias row.
        params["lstm"].append((
            u(ks[0], (d_in, 4 * H)), u(ks[1], (H, 4 * H)), u(ks[2], (1, 4 * H)),
            u(ks[3], (d_in, 4 * H)), u(ks[4], (H, 4 * H)), u(ks[5], (1, 4 * H)),
        ))
        d_in = 2 * H

    key, k1, k2, k3, k4 = jax.random.split(key, 5)
    bound2 = 1.0 / ((2 * H) ** 0.5)
    params["attn_w"] = jax.random.uniform(k1, (1, 2 * H), jnp.float32, -bound2, bound2)
    params["attn_b"] = jax.random.uniform(k2, (1,), jnp.float32, -bound2, bound2)
    params["fc_w"] = jax.random.uniform(k3, (1, 2 * H), jnp.float32, -bound2, bound2)
    params["fc_b"] = jax.random.uniform(k4, (1,), jnp.float32, -bound2, bound2)
    return params


if __name__ == "__main__":
    B, S, input_dim, hidden, num_layers = 8, 8, 4, 32, 2

    key = jax.random.PRNGKey(0)
    key, kx, kp = jax.random.split(key, 3)
    x = jax.random.normal(kx, (B, S, input_dim), dtype=jnp.float32)
    params = init_params(kp, input_dim, hidden, num_layers)

    fwd = jax.jit(functools.partial(stock_lstm_forward,
                                    hidden=hidden, num_layers=num_layers))
    out = jax.block_until_ready(fwd(x, params))

    ref = stock_lstm_ref(x, params, hidden, num_layers)
    assert out.shape == (B, 1)
    # tolerance accounts for possible MXU pass-precision differences between
    # the Pallas f32 matmuls and the XLA reference
    assert jnp.allclose(out, ref, atol=1e-2, rtol=1e-2), \
        float(jnp.max(jnp.abs(out - ref)))

    print("KERNEL_OK")
</pallas_src>

<mosaic_0001>
module attributes {stable_mosaic.version = 11 : i64} {
  func.func @kernel(%arg0: i32, %arg1: memref<1x8x8xf32, #tpu.memory_space<vmem>>, %arg2: memref<1x8x8xf32, #tpu.memory_space<vmem>>, %arg3: memref<8x128xf32, #tpu.memory_space<vmem>>, %arg4: memref<32x128xf32, #tpu.memory_space<vmem>>, %arg5: memref<1x128xf32, #tpu.memory_space<vmem>>, %arg6: memref<8x128xf32, #tpu.memory_space<vmem>>, %arg7: memref<32x128xf32, #tpu.memory_space<vmem>>, %arg8: memref<1x128xf32, #tpu.memory_space<vmem>>, %arg9: memref<1x8x32xf32, #tpu.memory_space<vmem>>, %arg10: memref<1x8x32xf32, #tpu.memory_space<vmem>>, %arg11: memref<8x32xf32, #tpu.memory_space<vmem>>, %arg12: memref<8x32xf32, #tpu.memory_space<vmem>>, %arg13: memref<8x32xf32, #tpu.memory_space<vmem>>, %arg14: memref<8x32xf32, #tpu.memory_space<vmem>>) attributes {dimension_semantics = [#tpu.dimension_semantics<arbitrary>], iteration_bounds = array<i64: 8>, scalar_prefetch = 0 : i64, scratch_operands = 4 : i64, tpu.core_type = #tpu.core_type<tc>, window_params = [{transform_indices = @transform_0, window_bounds = array<i64: 1, 8, 8>}, {transform_indices = @transform_1, window_bounds = array<i64: 1, 8, 8>}, {pipeline_mode = #tpu.pipeline_mode<synchronous>, transform_indices = @transform_2, window_bounds = array<i64: 8, 128>}, {pipeline_mode = #tpu.pipeline_mode<synchronous>, transform_indices = @transform_3, window_bounds = array<i64: 32, 128>}, {pipeline_mode = #tpu.pipeline_mode<synchronous>, transform_indices = @transform_4, window_bounds = array<i64: 1, 128>}, {pipeline_mode = #tpu.pipeline_mode<synchronous>, transform_indices = @transform_5, window_bounds = array<i64: 8, 128>}, {pipeline_mode = #tpu.pipeline_mode<synchronous>, transform_indices = @transform_6, window_bounds = array<i64: 32, 128>}, {pipeline_mode = #tpu.pipeline_mode<synchronous>, transform_indices = @transform_7, window_bounds = array<i64: 1, 128>}, {transform_indices = @transform_8, window_bounds = array<i64: 1, 8, 32>}, {transform_indices = @transform_9, window_bounds = array<i64: 1, 8, 32>}]} {
    %c0_i32 = arith.constant 0 : i32
    %0 = arith.cmpi eq, %arg0, %c0_i32 : i32
    %1 = arith.extui %0 : i1 to i32
    %c0_i32_0 = arith.constant 0 : i32
    %2 = arith.cmpi ne, %1, %c0_i32_0 : i32
    scf.if %2 {
      %cst_49 = arith.constant 0.000000e+00 : f32
      %87 = vector.broadcast %cst_49 : f32 to vector<8x32xf32>
      %c0_50 = arith.constant 0 : index
      %c0_51 = arith.constant 0 : index
      %88 = vector.load %arg11[%c0_50, %c0_51] : memref<8x32xf32, #tpu.memory_space<vmem>>, vector<8x32xf32>
      tpu.vector_store %arg11[%c0_50, %c0_51], %87 {strides = array<i32>} : memref<8x32xf32, #tpu.memory_space<vmem>>, vector<8x32xf32>,
      %cst_52 = arith.constant 0.000000e+00 : f32
      %89 = vector.broadcast %cst_52 : f32 to vector<8x32xf32>
      %c0_53 = arith.constant 0 : index
      %c0_54 = arith.constant 0 : index
      %90 = vector.load %arg12[%c0_53, %c0_54] : memref<8x32xf32, #tpu.memory_space<vmem>>, vector<8x32xf32>
      tpu.vector_store %arg12[%c0_53, %c0_54], %89 {strides = array<i32>} : memref<8x32xf32, #tpu.memory_space<vmem>>, vector<8x32xf32>,
      %cst_55 = arith.constant 0.000000e+00 : f32
      %91 = vector.broadcast %cst_55 : f32 to vector<8x32xf32>
      %c0_56 = arith.constant 0 : index
      %c0_57 = arith.constant 0 : index
      %92 = vector.load %arg13[%c0_56, %c0_57] : memref<8x32xf32, #tpu.memory_space<vmem>>, vector<8x32xf32>
      tpu.vector_store %arg13[%c0_56, %c0_57], %91 {strides = array<i32>} : memref<8x32xf32, #tpu.memory_space<vmem>>, vector<8x32xf32>,
      %cst_58 = arith.constant 0.000000e+00 : f32
      %93 = vector.broadcast %cst_58 : f32 to vector<8x32xf32>
      %c0_59 = arith.constant 0 : index
      %c0_60 = arith.constant 0 : index
      %94 = vector.load %arg14[%c0_59, %c0_60] : memref<8x32xf32, #tpu.memory_space<vmem>>, vector<8x32xf32>
      tpu.vector_store %arg14[%c0_59, %c0_60], %93 {strides = array<i32>} : memref<8x32xf32, #tpu.memory_space<vmem>>, vector<8x32xf32>,
    } else {
    }
    %c0 = arith.constant 0 : index
    %c0_1 = arith.constant 0 : index
    %c0_2 = arith.constant 0 : index
    %3 = vector.load %arg1[%c0, %c0_1, %c0_2] : memref<1x8x8xf32, #tpu.memory_space<vmem>>, vector<1x8x8xf32>
    %4 = vector.shape_cast %3 : vector<1x8x8xf32> to vector<8x8xf32>
    %c0_3 = arith.constant 0 : index
    %c0_4 = arith.constant 0 : index
    %5 = vector.load %arg11[%c0_3, %c0_4] : memref<8x32xf32, #tpu.memory_space<vmem>>, vector<8x32xf32>
    %c0_5 = arith.constant 0 : index
    %c0_6 = arith.constant 0 : index
    %6 = vector.load %arg12[%c0_5, %c0_6] : memref<8x32xf32, #tpu.memory_space<vmem>>, vector<8x32xf32>
    %c0_7 = arith.constant 0 : index
    %c0_8 = arith.constant 0 : index
    %7 = vector.load %arg3[%c0_7, %c0_8] : memref<8x128xf32, #tpu.memory_space<vmem>>, vector<8x128xf32>
    %cst = arith.constant dense<0.000000e+00> : vector<8x128xf32>
    %8 = tpu.matmul %4, %7, %cst {dimension_numbers = #tpu.dot_dimension_numbers<[1], [0], [0], [1], [0, 0, 1, 1], [], []>} : vector<8x8xf32>, vector<8x128xf32>, vector<8x128xf32> -> vector<8x128xf32>
    %c0_9 = arith.constant 0 : index
    %c0_10 = arith.constant 0 : index
    %9 = vector.load %arg4[%c0_9, %c0_10] : memref<32x128xf32, #tpu.memory_space<vmem>>, vector<32x128xf32>
    %cst_11 = arith.constant dense<0.000000e+00> : vector<8x128xf32>
    %10 = tpu.matmul %5, %9, %cst_11 {dimension_numbers = #tpu.dot_dimension_numbers<[1], [0], [0], [1], [0, 0, 1, 1], [], []>} : vector<8x32xf32>, vector<32x128xf32>, vector<8x128xf32> -> vector<8x128xf32>
    %11 = arith.addf %8, %10 : vector<8x128xf32>
    %c0_12 = arith.constant 0 : index
    %c0_13 = arith.constant 0 : index
    %12 = vector.load %arg5[%c0_12, %c0_13] : memref<1x128xf32, #tpu.memory_space<vmem>>, vector<1x128xf32>
    %13 = vector.broadcast %12 : vector<1x128xf32> to vector<8x128xf32>
    %14 = arith.addf %11, %13 : vector<8x128xf32>
    %15 = vector.extract_strided_slice %14 {offsets = [0, 0], sizes = [8, 32], strides = [1, 1]} : vector<8x128xf32> to vector<8x32xf32>
    %16 = arith.negf %15 : vector<8x32xf32>
    %17 = math.exp %16 : vector<8x32xf32>
    %cst_14 = arith.constant 1.000000e+00 : f32
    %18 = vector.broadcast %cst_14 : f32 to vector<8x32xf32>
    %19 = arith.addf %18, %17 : vector<8x32xf32>
    %20 = arith.divf %18, %19 : vector<8x32xf32>
    %21 = vector.extract_strided_slice %14 {offsets = [0, 32], sizes = [8, 32], strides = [1, 1]} : vector<8x128xf32> to vector<8x32xf32>
    %22 = arith.negf %21 : vector<8x32xf32>
    %23 = math.exp %22 : vector<8x32xf32>
    %cst_15 = arith.constant 1.000000e+00 : f32
    %24 = vector.broadcast %cst_15 : f32 to vector<8x32xf32>
    %25 = arith.addf %24, %23 : vector<8x32xf32>
    %26 = arith.divf %24, %25 : vector<8x32xf32>
    %27 = vector.extract_strided_slice %14 {offsets = [0, 64], sizes = [8, 32], strides = [1, 1]} : vector<8x128xf32> to vector<8x32xf32>
    %28 = math.tanh %27 : vector<8x32xf32>
    %29 = vector.extract_strided_slice %14 {offsets = [0, 96], sizes = [8, 32], strides = [1, 1]} : vector<8x128xf32> to vector<8x32xf32>
    %30 = arith.negf %29 : vector<8x32xf32>
    %31 = math.exp %30 : vector<8x32xf32>
    %cst_16 = arith.constant 1.000000e+00 : f32
    %32 = vector.broadcast %cst_16 : f32 to vector<8x32xf32>
    %33 = arith.addf %32, %31 : vector<8x32xf32>
    %34 = arith.divf %32, %33 : vector<8x32xf32>
    %35 = arith.mulf %26, %6 : vector<8x32xf32>
    %36 = arith.mulf %20, %28 : vector<8x32xf32>
    %37 = arith.addf %35, %36 : vector<8x32xf32>
    %38 = math.tanh %37 : vector<8x32xf32>
    %39 = arith.mulf %34, %38 : vector<8x32xf32>
    %c0_17 = arith.constant 0 : index
    %c0_18 = arith.constant 0 : index
    %40 = vector.load %arg11[%c0_17, %c0_18] : memref<8x32xf32, #tpu.memory_space<vmem>>, vector<8x32xf32>
    tpu.vector_store %arg11[%c0_17, %c0_18], %39 {strides = array<i32>} : memref<8x32xf32, #tpu.memory_space<vmem>>, vector<8x32xf32>,
    %c0_19 = arith.constant 0 : index
    %c0_20 = arith.constant 0 : index
    %41 = vector.load %arg12[%c0_19, %c0_20] : memref<8x32xf32, #tpu.memory_space<vmem>>, vector<8x32xf32>
    tpu.vector_store %arg12[%c0_19, %c0_20], %37 {strides = array<i32>} : memref<8x32xf32, #tpu.memory_space<vmem>>, vector<8x32xf32>,
    %c0_21 = arith.constant 0 : index
    %c0_22 = arith.constant 0 : index
    %c0_23 = arith.constant 0 : index
    %42 = vector.load %arg9[%c0_21, %c0_22, %c0_23] : memref<1x8x32xf32, #tpu.memory_space<vmem>>, vector<1x8x32xf32>
    %43 = vector.shape_cast %42 : vector<1x8x32xf32> to vector<8x32xf32>
    %44 = vector.shape_cast %39 : vector<8x32xf32> to vector<1x8x32xf32>
    tpu.vector_store %arg9[%c0_21, %c0_22, %c0_23], %44 {strides = array<i32>} : memref<1x8x32xf32, #tpu.memory_space<vmem>>, vector<1x8x32xf32>,
    %c0_24 = arith.constant 0 : index
    %c0_25 = arith.constant 0 : index
    %c0_26 = arith.constant 0 : index
    %45 = vector.load %arg2[%c0_24, %c0_25, %c0_26] : memref<1x8x8xf32, #tpu.memory_space<vmem>>, vector<1x8x8xf32>
    %46 = vector.shape_cast %45 : vector<1x8x8xf32> to vector<8x8xf32>
    %c0_27 = arith.constant 0 : index
    %c0_28 = arith.constant 0 : index
    %47 = vector.load %arg13[%c0_27, %c0_28] : memref<8x32xf32, #tpu.memory_space<vmem>>, vector<8x32xf32>
    %c0_29 = arith.constant 0 : index
    %c0_30 = arith.constant 0 : index
    %48 = vector.load %arg14[%c0_29, %c0_30] : memref<8x32xf32, #tpu.memory_space<vmem>>, vector<8x32xf32>
    %c0_31 = arith.constant 0 : index
    %c0_32 = arith.constant 0 : index
    %49 = vector.load %arg6[%c0_31, %c0_32] : memref<8x128xf32, #tpu.memory_space<vmem>>, vector<8x128xf32>
    %cst_33 = arith.constant dense<0.000000e+00> : vector<8x128xf32>
    %50 = tpu.matmul %46, %49, %cst_33 {dimension_numbers = #tpu.dot_dimension_numbers<[1], [0], [0], [1], [0, 0, 1, 1], [], []>} : vector<8x8xf32>, vector<8x128xf32>, vector<8x128xf32> -> vector<8x128xf32>
    %c0_34 = arith.constant 0 : index
    %c0_35 = arith.constant 0 : index
    %51 = vector.load %arg7[%c0_34, %c0_35] : memref<32x128xf32, #tpu.memory_space<vmem>>, vector<32x128xf32>
    %cst_36 = arith.constant dense<0.000000e+00> : vector<8x128xf32>
    %52 = tpu.matmul %47, %51, %cst_36 {dimension_numbers = #tpu.dot_dimension_numbers<[1], [0], [0], [1], [0, 0, 1, 1], [], []>} : vector<8x32xf32>, vector<32x128xf32>, vector<8x128xf32> -> vector<8x128xf32>
    %53 = arith.addf %50, %52 : vector<8x128xf32>
    %c0_37 = arith.constant 0 : index
    %c0_38 = arith.constant 0 : index
    %54 = vector.load %arg8[%c0_37, %c0_38] : memref<1x128xf32, #tpu.memory_space<vmem>>, vector<1x128xf32>
    %55 = vector.broadcast %54 : vector<1x128xf32> to vector<8x128xf32>
    %56 = arith.addf %53, %55 : vector<8x128xf32>
    %57 = vector.extract_strided_slice %56 {offsets = [0, 0], sizes = [8, 32], strides = [1, 1]} : vector<8x128xf32> to vector<8x32xf32>
    %58 = arith.negf %57 : vector<8x32xf32>
    %59 = math.exp %58 : vector<8x32xf32>
    %cst_39 = arith.constant 1.000000e+00 : f32
    %60 = vector.broadcast %cst_39 : f32 to vector<8x32xf32>
    %61 = arith.addf %60, %59 : vector<8x32xf32>
    %62 = arith.divf %60, %61 : vector<8x32xf32>
    %63 = vector.extract_strided_slice %56 {offsets = [0, 32], sizes = [8, 32], strides = [1, 1]} : vector<8x128xf32> to vector<8x32xf32>
    %64 = arith.negf %63 : vector<8x32xf32>
    %65 = math.exp %64 : vector<8x32xf32>
    %cst_40 = arith.constant 1.000000e+00 : f32
    %66 = vector.broadcast %cst_40 : f32 to vector<8x32xf32>
    %67 = arith.addf %66, %65 : vector<8x32xf32>
    %68 = arith.divf %66, %67 : vector<8x32xf32>
    %69 = vector.extract_strided_slice %56 {offsets = [0, 64], sizes = [8, 32], strides = [1, 1]} : vector<8x128xf32> to vector<8x32xf32>
    %70 = math.tanh %69 : vector<8x32xf32>
    %71 = vector.extract_strided_slice %56 {offsets = [0, 96], sizes = [8, 32], strides = [1, 1]} : vector<8x128xf32> to vector<8x32xf32>
    %72 = arith.negf %71 : vector<8x32xf32>
    %73 = math.exp %72 : vector<8x32xf32>
    %cst_41 = arith.constant 1.000000e+00 : f32
    %74 = vector.broadcast %cst_41 : f32 to vector<8x32xf32>
    %75 = arith.addf %74, %73 : vector<8x32xf32>
    %76 = arith.divf %74, %75 : vector<8x32xf32>
    %77 = arith.mulf %68, %48 : vector<8x32xf32>
    %78 = arith.mulf %62, %70 : vector<8x32xf32>
    %79 = arith.addf %77, %78 : vector<8x32xf32>
    %80 = math.tanh %79 : vector<8x32xf32>
    %81 = arith.mulf %76, %80 : vector<8x32xf32>
    %c0_42 = arith.constant 0 : index
    %c0_43 = arith.constant 0 : index
    %82 = vector.load %arg13[%c0_42, %c0_43] : memref<8x32xf32, #tpu.memory_space<vmem>>, vector<8x32xf32>
    tpu.vector_store %arg13[%c0_42, %c0_43], %81 {strides = array<i32>} : memref<8x32xf32, #tpu.memory_space<vmem>>, vector<8x32xf32>,
    %c0_44 = arith.constant 0 : index
    %c0_45 = arith.constant 0 : index
    %83 = vector.load %arg14[%c0_44, %c0_45] : memref<8x32xf32, #tpu.memory_space<vmem>>, vector<8x32xf32>
    tpu.vector_store %arg14[%c0_44, %c0_45], %79 {strides = array<i32>} : memref<8x32xf32, #tpu.memory_space<vmem>>, vector<8x32xf32>,
    %c0_46 = arith.constant 0 : index
    %c0_47 = arith.constant 0 : index
    %c0_48 = arith.constant 0 : index
    %84 = vector.load %arg10[%c0_46, %c0_47, %c0_48] : memref<1x8x32xf32, #tpu.memory_space<vmem>>, vector<1x8x32xf32>
    %85 = vector.shape_cast %84 : vector<1x8x32xf32> to vector<8x32xf32>
    %86 = vector.shape_cast %81 : vector<8x32xf32> to vector<1x8x32xf32>
    tpu.vector_store %arg10[%c0_46, %c0_47, %c0_48], %86 {strides = array<i32>} : memref<1x8x32xf32, #tpu.memory_space<vmem>>, vector<1x8x32xf32>,
    return
  }
  func.func @transform_0(%arg0: i32) -> (i32, i32, i32) {
    %c0_i32 = arith.constant 0 : i32
    %c0_i32_0 = arith.constant 0 : i32
    %c0_i32_1 = arith.constant 0 : i32
    return %arg0, %c0_i32, %c0_i32_0 : i32, i32, i32
  }
  func.func @transform_1(%arg0: i32) -> (i32, i32, i32) {
    %c7_i32 = arith.constant 7 : i32
    %0 = arith.subi %c7_i32, %arg0 : i32
    %c0_i32 = arith.constant 0 : i32
    %c0_i32_0 = arith.constant 0 : i32
    %c0_i32_1 = arith.constant 0 : i32
    return %0, %c0_i32, %c0_i32_0 : i32, i32, i32
  }
  func.func @transform_2(%arg0: i32) -> (i32, i32) {
    %c0_i32 = arith.constant 0 : i32
    %c0_i32_0 = arith.constant 0 : i32
    %c0_i32_1 = arith.constant 0 : i32
    return %c0_i32, %c0_i32_0 : i32, i32
  }
  func.func @transform_3(%arg0: i32) -> (i32, i32) {
    %c0_i32 = arith.constant 0 : i32
    %c0_i32_0 = arith.constant 0 : i32
    %c0_i32_1 = arith.constant 0 : i32
    return %c0_i32, %c0_i32_0 : i32, i32
  }
  func.func @transform_4(%arg0: i32) -> (i32, i32) {
    %c0_i32 = arith.constant 0 : i32
    %c0_i32_0 = arith.constant 0 : i32
    %c0_i32_1 = arith.constant 0 : i32
    return %c0_i32, %c0_i32_0 : i32, i32
  }
  func.func @transform_5(%arg0: i32) -> (i32, i32) {
    %c0_i32 = arith.constant 0 : i32
    %c0_i32_0 = arith.constant 0 : i32
    %c0_i32_1 = arith.constant 0 : i32
    return %c0_i32, %c0_i32_0 : i32, i32
  }
  func.func @transform_6(%arg0: i32) -> (i32, i32) {
    %c0_i32 = arith.constant 0 : i32
    %c0_i32_0 = arith.constant 0 : i32
    %c0_i32_1 = arith.constant 0 : i32
    return %c0_i32, %c0_i32_0 : i32, i32
  }
  func.func @transform_7(%arg0: i32) -> (i32, i32) {
    %c0_i32 = arith.constant 0 : i32
    %c0_i32_0 = arith.constant 0 : i32
    %c0_i32_1 = arith.constant 0 : i32
    return %c0_i32, %c0_i32_0 : i32, i32
  }
  func.func @transform_8(%arg0: i32) -> (i32, i32, i32) {
    %c0_i32 = arith.constant 0 : i32
    %c0_i32_0 = arith.constant 0 : i32
    %c0_i32_1 = arith.constant 0 : i32
    return %arg0, %c0_i32, %c0_i32_0 : i32, i32, i32
  }
  func.func @transform_9(%arg0: i32) -> (i32, i32, i32) {
    %c7_i32 = arith.constant 7 : i32
    %0 = arith.subi %c7_i32, %arg0 : i32
    %c0_i32 = arith.constant 0 : i32
    %c0_i32_0 = arith.constant 0 : i32
    %c0_i32_1 = arith.constant 0 : i32
    return %0, %c0_i32, %c0_i32_0 : i32, i32, i32
  }
}

module attributes {stable_mosaic.version = 11 : i64} {
  func.func @kernel(%arg0: i32, %arg1: memref<1x8x64xf32, #tpu.memory_space<vmem>>, %arg2: memref<1x8x64xf32, #tpu.memory_space<vmem>>, %arg3: memref<64x128xf32, #tpu.memory_space<vmem>>, %arg4: memref<32x128xf32, #tpu.memory_space<vmem>>, %arg5: memref<1x128xf32, #tpu.memory_space<vmem>>, %arg6: memref<64x128xf32, #tpu.memory_space<vmem>>, %arg7: memref<32x128xf32, #tpu.memory_space<vmem>>, %arg8: memref<1x128xf32, #tpu.memory_space<vmem>>, %arg9: memref<1x8x32xf32, #tpu.memory_space<vmem>>, %arg10: memref<1x8x32xf32, #tpu.memory_space<vmem>>, %arg11: memref<8x32xf32, #tpu.memory_space<vmem>>, %arg12: memref<8x32xf32, #tpu.memory_space<vmem>>, %arg13: memref<8x32xf32, #tpu.memory_space<vmem>>, %arg14: memref<8x32xf32, #tpu.memory_space<vmem>>) attributes {dimension_semantics = [#tpu.dimension_semantics<arbitrary>], iteration_bounds = array<i64: 8>, scalar_prefetch = 0 : i64, scratch_operands = 4 : i64, tpu.core_type = #tpu.core_type<tc>, window_params = [{transform_indices = @transform_0, window_bounds = array<i64: 1, 8, 64>}, {transform_indices = @transform_1, window_bounds = array<i64: 1, 8, 64>}, {pipeline_mode = #tpu.pipeline_mode<synchronous>, transform_indices = @transform_2, window_bounds = array<i64: 64, 128>}, {pipeline_mode = #tpu.pipeline_mode<synchronous>, transform_indices = @transform_3, window_bounds = array<i64: 32, 128>}, {pipeline_mode = #tpu.pipeline_mode<synchronous>, transform_indices = @transform_4, window_bounds = array<i64: 1, 128>}, {pipeline_mode = #tpu.pipeline_mode<synchronous>, transform_indices = @transform_5, window_bounds = array<i64: 64, 128>}, {pipeline_mode = #tpu.pipeline_mode<synchronous>, transform_indices = @transform_6, window_bounds = array<i64: 32, 128>}, {pipeline_mode = #tpu.pipeline_mode<synchronous>, transform_indices = @transform_7, window_bounds = array<i64: 1, 128>}, {transform_indices = @transform_8, window_bounds = array<i64: 1, 8, 32>}, {transform_indices = @transform_9, window_bounds = array<i64: 1, 8, 32>}]} {
    %c0_i32 = arith.constant 0 : i32
    %0 = arith.cmpi eq, %arg0, %c0_i32 : i32
    %1 = arith.extui %0 : i1 to i32
    %c0_i32_0 = arith.constant 0 : i32
    %2 = arith.cmpi ne, %1, %c0_i32_0 : i32
    scf.if %2 {
      %cst_49 = arith.constant 0.000000e+00 : f32
      %87 = vector.broadcast %cst_49 : f32 to vector<8x32xf32>
      %c0_50 = arith.constant 0 : index
      %c0_51 = arith.constant 0 : index
      %88 = vector.load %arg11[%c0_50, %c0_51] : memref<8x32xf32, #tpu.memory_space<vmem>>, vector<8x32xf32>
      tpu.vector_store %arg11[%c0_50, %c0_51], %87 {strides = array<i32>} : memref<8x32xf32, #tpu.memory_space<vmem>>, vector<8x32xf32>,
      %cst_52 = arith.constant 0.000000e+00 : f32
      %89 = vector.broadcast %cst_52 : f32 to vector<8x32xf32>
      %c0_53 = arith.constant 0 : index
      %c0_54 = arith.constant 0 : index
      %90 = vector.load %arg12[%c0_53, %c0_54] : memref<8x32xf32, #tpu.memory_space<vmem>>, vector<8x32xf32>
      tpu.vector_store %arg12[%c0_53, %c0_54], %89 {strides = array<i32>} : memref<8x32xf32, #tpu.memory_space<vmem>>, vector<8x32xf32>,
      %cst_55 = arith.constant 0.000000e+00 : f32
      %91 = vector.broadcast %cst_55 : f32 to vector<8x32xf32>
      %c0_56 = arith.constant 0 : index
      %c0_57 = arith.constant 0 : index
      %92 = vector.load %arg13[%c0_56, %c0_57] : memref<8x32xf32, #tpu.memory_space<vmem>>, vector<8x32xf32>
      tpu.vector_store %arg13[%c0_56, %c0_57], %91 {strides = array<i32>} : memref<8x32xf32, #tpu.memory_space<vmem>>, vector<8x32xf32>,
      %cst_58 = arith.constant 0.000000e+00 : f32
      %93 = vector.broadcast %cst_58 : f32 to vector<8x32xf32>
      %c0_59 = arith.constant 0 : index
      %c0_60 = arith.constant 0 : index
      %94 = vector.load %arg14[%c0_59, %c0_60] : memref<8x32xf32, #tpu.memory_space<vmem>>, vector<8x32xf32>
      tpu.vector_store %arg14[%c0_59, %c0_60], %93 {strides = array<i32>} : memref<8x32xf32, #tpu.memory_space<vmem>>, vector<8x32xf32>,
    } else {
    }
    %c0 = arith.constant 0 : index
    %c0_1 = arith.constant 0 : index
    %c0_2 = arith.constant 0 : index
    %3 = vector.load %arg1[%c0, %c0_1, %c0_2] : memref<1x8x64xf32, #tpu.memory_space<vmem>>, vector<1x8x64xf32>
    %4 = vector.shape_cast %3 : vector<1x8x64xf32> to vector<8x64xf32>
    %c0_3 = arith.constant 0 : index
    %c0_4 = arith.constant 0 : index
    %5 = vector.load %arg11[%c0_3, %c0_4] : memref<8x32xf32, #tpu.memory_space<vmem>>, vector<8x32xf32>
    %c0_5 = arith.constant 0 : index
    %c0_6 = arith.constant 0 : index
    %6 = vector.load %arg12[%c0_5, %c0_6] : memref<8x32xf32, #tpu.memory_space<vmem>>, vector<8x32xf32>
    %c0_7 = arith.constant 0 : index
    %c0_8 = arith.constant 0 : index
    %7 = vector.load %arg3[%c0_7, %c0_8] : memref<64x128xf32, #tpu.memory_space<vmem>>, vector<64x128xf32>
    %cst = arith.constant dense<0.000000e+00> : vector<8x128xf32>
    %8 = tpu.matmul %4, %7, %cst {dimension_numbers = #tpu.dot_dimension_numbers<[1], [0], [0], [1], [0, 0, 1, 1], [], []>} : vector<8x64xf32>, vector<64x128xf32>, vector<8x128xf32> -> vector<8x128xf32>
    %c0_9 = arith.constant 0 : index
    %c0_10 = arith.constant 0 : index
    %9 = vector.load %arg4[%c0_9, %c0_10] : memref<32x128xf32, #tpu.memory_space<vmem>>, vector<32x128xf32>
    %cst_11 = arith.constant dense<0.000000e+00> : vector<8x128xf32>
    %10 = tpu.matmul %5, %9, %cst_11 {dimension_numbers = #tpu.dot_dimension_numbers<[1], [0], [0], [1], [0, 0, 1, 1], [], []>} : vector<8x32xf32>, vector<32x128xf32>, vector<8x128xf32> -> vector<8x128xf32>
    %11 = arith.addf %8, %10 : vector<8x128xf32>
    %c0_12 = arith.constant 0 : index
    %c0_13 = arith.constant 0 : index
    %12 = vector.load %arg5[%c0_12, %c0_13] : memref<1x128xf32, #tpu.memory_space<vmem>>, vector<1x128xf32>
    %13 = vector.broadcast %12 : vector<1x128xf32> to vector<8x128xf32>
    %14 = arith.addf %11, %13 : vector<8x128xf32>
    %15 = vector.extract_strided_slice %14 {offsets = [0, 0], sizes = [8, 32], strides = [1, 1]} : vector<8x128xf32> to vector<8x32xf32>
    %16 = arith.negf %15 : vector<8x32xf32>
    %17 = math.exp %16 : vector<8x32xf32>
    %cst_14 = arith.constant 1.000000e+00 : f32
    %18 = vector.broadcast %cst_14 : f32 to vector<8x32xf32>
    %19 = arith.addf %18, %17 : vector<8x32xf32>
    %20 = arith.divf %18, %19 : vector<8x32xf32>
    %21 = vector.extract_strided_slice %14 {offsets = [0, 32], sizes = [8, 32], strides = [1, 1]} : vector<8x128xf32> to vector<8x32xf32>
    %22 = arith.negf %21 : vector<8x32xf32>
    %23 = math.exp %22 : vector<8x32xf32>
    %cst_15 = arith.constant 1.000000e+00 : f32
    %24 = vector.broadcast %cst_15 : f32 to vector<8x32xf32>
    %25 = arith.addf %24, %23 : vector<8x32xf32>
    %26 = arith.divf %24, %25 : vector<8x32xf32>
    %27 = vector.extract_strided_slice %14 {offsets = [0, 64], sizes = [8, 32], strides = [1, 1]} : vector<8x128xf32> to vector<8x32xf32>
    %28 = math.tanh %27 : vector<8x32xf32>
    %29 = vector.extract_strided_slice %14 {offsets = [0, 96], sizes = [8, 32], strides = [1, 1]} : vector<8x128xf32> to vector<8x32xf32>
    %30 = arith.negf %29 : vector<8x32xf32>
    %31 = math.exp %30 : vector<8x32xf32>
    %cst_16 = arith.constant 1.000000e+00 : f32
    %32 = vector.broadcast %cst_16 : f32 to vector<8x32xf32>
    %33 = arith.addf %32, %31 : vector<8x32xf32>
    %34 = arith.divf %32, %33 : vector<8x32xf32>
    %35 = arith.mulf %26, %6 : vector<8x32xf32>
    %36 = arith.mulf %20, %28 : vector<8x32xf32>
    %37 = arith.addf %35, %36 : vector<8x32xf32>
    %38 = math.tanh %37 : vector<8x32xf32>
    %39 = arith.mulf %34, %38 : vector<8x32xf32>
    %c0_17 = arith.constant 0 : index
    %c0_18 = arith.constant 0 : index
    %40 = vector.load %arg11[%c0_17, %c0_18] : memref<8x32xf32, #tpu.memory_space<vmem>>, vector<8x32xf32>
    tpu.vector_store %arg11[%c0_17, %c0_18], %39 {strides = array<i32>} : memref<8x32xf32, #tpu.memory_space<vmem>>, vector<8x32xf32>,
    %c0_19 = arith.constant 0 : index
    %c0_20 = arith.constant 0 : index
    %41 = vector.load %arg12[%c0_19, %c0_20] : memref<8x32xf32, #tpu.memory_space<vmem>>, vector<8x32xf32>
    tpu.vector_store %arg12[%c0_19, %c0_20], %37 {strides = array<i32>} : memref<8x32xf32, #tpu.memory_space<vmem>>, vector<8x32xf32>,
    %c0_21 = arith.constant 0 : index
    %c0_22 = arith.constant 0 : index
    %c0_23 = arith.constant 0 : index
    %42 = vector.load %arg9[%c0_21, %c0_22, %c0_23] : memref<1x8x32xf32, #tpu.memory_space<vmem>>, vector<1x8x32xf32>
    %43 = vector.shape_cast %42 : vector<1x8x32xf32> to vector<8x32xf32>
    %44 = vector.shape_cast %39 : vector<8x32xf32> to vector<1x8x32xf32>
    tpu.vector_store %arg9[%c0_21, %c0_22, %c0_23], %44 {strides = array<i32>} : memref<1x8x32xf32, #tpu.memory_space<vmem>>, vector<1x8x32xf32>,
    %c0_24 = arith.constant 0 : index
    %c0_25 = arith.constant 0 : index
    %c0_26 = arith.constant 0 : index
    %45 = vector.load %arg2[%c0_24, %c0_25, %c0_26] : memref<1x8x64xf32, #tpu.memory_space<vmem>>, vector<1x8x64xf32>
    %46 = vector.shape_cast %45 : vector<1x8x64xf32> to vector<8x64xf32>
    %c0_27 = arith.constant 0 : index
    %c0_28 = arith.constant 0 : index
    %47 = vector.load %arg13[%c0_27, %c0_28] : memref<8x32xf32, #tpu.memory_space<vmem>>, vector<8x32xf32>
    %c0_29 = arith.constant 0 : index
    %c0_30 = arith.constant 0 : index
    %48 = vector.load %arg14[%c0_29, %c0_30] : memref<8x32xf32, #tpu.memory_space<vmem>>, vector<8x32xf32>
    %c0_31 = arith.constant 0 : index
    %c0_32 = arith.constant 0 : index
    %49 = vector.load %arg6[%c0_31, %c0_32] : memref<64x128xf32, #tpu.memory_space<vmem>>, vector<64x128xf32>
    %cst_33 = arith.constant dense<0.000000e+00> : vector<8x128xf32>
    %50 = tpu.matmul %46, %49, %cst_33 {dimension_numbers = #tpu.dot_dimension_numbers<[1], [0], [0], [1], [0, 0, 1, 1], [], []>} : vector<8x64xf32>, vector<64x128xf32>, vector<8x128xf32> -> vector<8x128xf32>
    %c0_34 = arith.constant 0 : index
    %c0_35 = arith.constant 0 : index
    %51 = vector.load %arg7[%c0_34, %c0_35] : memref<32x128xf32, #tpu.memory_space<vmem>>, vector<32x128xf32>
    %cst_36 = arith.constant dense<0.000000e+00> : vector<8x128xf32>
    %52 = tpu.matmul %47, %51, %cst_36 {dimension_numbers = #tpu.dot_dimension_numbers<[1], [0], [0], [1], [0, 0, 1, 1], [], []>} : vector<8x32xf32>, vector<32x128xf32>, vector<8x128xf32> -> vector<8x128xf32>
    %53 = arith.addf %50, %52 : vector<8x128xf32>
    %c0_37 = arith.constant 0 : index
    %c0_38 = arith.constant 0 : index
    %54 = vector.load %arg8[%c0_37, %c0_38] : memref<1x128xf32, #tpu.memory_space<vmem>>, vector<1x128xf32>
    %55 = vector.broadcast %54 : vector<1x128xf32> to vector<8x128xf32>
    %56 = arith.addf %53, %55 : vector<8x128xf32>
    %57 = vector.extract_strided_slice %56 {offsets = [0, 0], sizes = [8, 32], strides = [1, 1]} : vector<8x128xf32> to vector<8x32xf32>
    %58 = arith.negf %57 : vector<8x32xf32>
    %59 = math.exp %58 : vector<8x32xf32>
    %cst_39 = arith.constant 1.000000e+00 : f32
    %60 = vector.broadcast %cst_39 : f32 to vector<8x32xf32>
    %61 = arith.addf %60, %59 : vector<8x32xf32>
    %62 = arith.divf %60, %61 : vector<8x32xf32>
    %63 = vector.extract_strided_slice %56 {offsets = [0, 32], sizes = [8, 32], strides = [1, 1]} : vector<8x128xf32> to vector<8x32xf32>
    %64 = arith.negf %63 : vector<8x32xf32>
    %65 = math.exp %64 : vector<8x32xf32>
    %cst_40 = arith.constant 1.000000e+00 : f32
    %66 = vector.broadcast %cst_40 : f32 to vector<8x32xf32>
    %67 = arith.addf %66, %65 : vector<8x32xf32>
    %68 = arith.divf %66, %67 : vector<8x32xf32>
    %69 = vector.extract_strided_slice %56 {offsets = [0, 64], sizes = [8, 32], strides = [1, 1]} : vector<8x128xf32> to vector<8x32xf32>
    %70 = math.tanh %69 : vector<8x32xf32>
    %71 = vector.extract_strided_slice %56 {offsets = [0, 96], sizes = [8, 32], strides = [1, 1]} : vector<8x128xf32> to vector<8x32xf32>
    %72 = arith.negf %71 : vector<8x32xf32>
    %73 = math.exp %72 : vector<8x32xf32>
    %cst_41 = arith.constant 1.000000e+00 : f32
    %74 = vector.broadcast %cst_41 : f32 to vector<8x32xf32>
    %75 = arith.addf %74, %73 : vector<8x32xf32>
    %76 = arith.divf %74, %75 : vector<8x32xf32>
    %77 = arith.mulf %68, %48 : vector<8x32xf32>
    %78 = arith.mulf %62, %70 : vector<8x32xf32>
    %79 = arith.addf %77, %78 : vector<8x32xf32>
    %80 = math.tanh %79 : vector<8x32xf32>
    %81 = arith.mulf %76, %80 : vector<8x32xf32>
    %c0_42 = arith.constant 0 : index
    %c0_43 = arith.constant 0 : index
    %82 = vector.load %arg13[%c0_42, %c0_43] : memref<8x32xf32, #tpu.memory_space<vmem>>, vector<8x32xf32>
    tpu.vector_store %arg13[%c0_42, %c0_43], %81 {strides = array<i32>} : memref<8x32xf32, #tpu.memory_space<vmem>>, vector<8x32xf32>,
    %c0_44 = arith.constant 0 : index
    %c0_45 = arith.constant 0 : index
    %83 = vector.load %arg14[%c0_44, %c0_45] : memref<8x32xf32, #tpu.memory_space<vmem>>, vector<8x32xf32>
    tpu.vector_store %arg14[%c0_44, %c0_45], %79 {strides = array<i32>} : memref<8x32xf32, #tpu.memory_space<vmem>>, vector<8x32xf32>,
    %c0_46 = arith.constant 0 : index
    %c0_47 = arith.constant 0 : index
    %c0_48 = arith.constant 0 : index
    %84 = vector.load %arg10[%c0_46, %c0_47, %c0_48] : memref<1x8x32xf32, #tpu.memory_space<vmem>>, vector<1x8x32xf32>
    %85 = vector.shape_cast %84 : vector<1x8x32xf32> to vector<8x32xf32>
    %86 = vector.shape_cast %81 : vector<8x32xf32> to vector<1x8x32xf32>
    tpu.vector_store %arg10[%c0_46, %c0_47, %c0_48], %86 {strides = array<i32>} : memref<1x8x32xf32, #tpu.memory_space<vmem>>, vector<1x8x32xf32>,
    return
  }
  func.func @transform_0(%arg0: i32) -> (i32, i32, i32) {
    %c0_i32 = arith.constant 0 : i32
    %c0_i32_0 = arith.constant 0 : i32
    %c0_i32_1 = arith.constant 0 : i32
    return %arg0, %c0_i32, %c0_i32_0 : i32, i32, i32
  }
  func.func @transform_1(%arg0: i32) -> (i32, i32, i32) {
    %c7_i32 = arith.constant 7 : i32
    %0 = arith.subi %c7_i32, %arg0 : i32
    %c0_i32 = arith.constant 0 : i32
    %c0_i32_0 = arith.constant 0 : i32
    %c0_i32_1 = arith.constant 0 : i32
    return %0, %c0_i32, %c0_i32_0 : i32, i32, i32
  }
  func.func @transform_2(%arg0: i32) -> (i32, i32) {
    %c0_i32 = arith.constant 0 : i32
    %c0_i32_0 = arith.constant 0 : i32
    %c0_i32_1 = arith.constant 0 : i32
    return %c0_i32, %c0_i32_0 : i32, i32
  }
  func.func @transform_3(%arg0: i32) -> (i32, i32) {
    %c0_i32 = arith.constant 0 : i32
    %c0_i32_0 = arith.constant 0 : i32
    %c0_i32_1 = arith.constant 0 : i32
    return %c0_i32, %c0_i32_0 : i32, i32
  }
  func.func @transform_4(%arg0: i32) -> (i32, i32) {
    %c0_i32 = arith.constant 0 : i32
    %c0_i32_0 = arith.constant 0 : i32
    %c0_i32_1 = arith.constant 0 : i32
    return %c0_i32, %c0_i32_0 : i32, i32
  }
  func.func @transform_5(%arg0: i32) -> (i32, i32) {
    %c0_i32 = arith.constant 0 : i32
    %c0_i32_0 = arith.constant 0 : i32
    %c0_i32_1 = arith.constant 0 : i32
    return %c0_i32, %c0_i32_0 : i32, i32
  }
  func.func @transform_6(%arg0: i32) -> (i32, i32) {
    %c0_i32 = arith.constant 0 : i32
    %c0_i32_0 = arith.constant 0 : i32
    %c0_i32_1 = arith.constant 0 : i32
    return %c0_i32, %c0_i32_0 : i32, i32
  }
  func.func @transform_7(%arg0: i32) -> (i32, i32) {
    %c0_i32 = arith.constant 0 : i32
    %c0_i32_0 = arith.constant 0 : i32
    %c0_i32_1 = arith.constant 0 : i32
    return %c0_i32, %c0_i32_0 : i32, i32
  }
  func.func @transform_8(%arg0: i32) -> (i32, i32, i32) {
    %c0_i32 = arith.constant 0 : i32
    %c0_i32_0 = arith.constant 0 : i32
    %c0_i32_1 = arith.constant 0 : i32
    return %arg0, %c0_i32, %c0_i32_0 : i32, i32, i32
  }
  func.func @transform_9(%arg0: i32) -> (i32, i32, i32) {
    %c7_i32 = arith.constant 7 : i32
    %0 = arith.subi %c7_i32, %arg0 : i32
    %c0_i32 = arith.constant 0 : i32
    %c0_i32_0 = arith.constant 0 : i32
    %c0_i32_1 = arith.constant 0 : i32
    return %0, %c0_i32, %c0_i32_0 : i32, i32, i32
  }
}

module attributes {stable_mosaic.version = 11 : i64} {
  func.func @attn_fc_kernel(%arg0: i32, %arg1: memref<8x8x64xf32, #tpu.memory_space<vmem>>, %arg2: memref<1x64xf32, #tpu.memory_space<vmem>>, %arg3: memref<1x1xf32, #tpu.memory_space<vmem>>, %arg4: memref<1x64xf32, #tpu.memory_space<vmem>>, %arg5: memref<1x1xf32, #tpu.memory_space<vmem>>, %arg6: memref<8x1xf32, #tpu.memory_space<vmem>>) attributes {dimension_semantics = [#tpu.dimension_semantics<parallel>], iteration_bounds = array<i64: 1>, scalar_prefetch = 0 : i64, scratch_operands = 0 : i64, tpu.core_type = #tpu.core_type<tc>, window_params = [{transform_indices = @transform_0, window_bounds = array<i64: 8, 8, 64>}, {pipeline_mode = #tpu.pipeline_mode<synchronous>, transform_indices = @transform_1, window_bounds = array<i64: 1, 64>}, {pipeline_mode = #tpu.pipeline_mode<synchronous>, transform_indices = @transform_2, window_bounds = array<i64: 1, 1>}, {pipeline_mode = #tpu.pipeline_mode<synchronous>, transform_indices = @transform_3, window_bounds = array<i64: 1, 64>}, {pipeline_mode = #tpu.pipeline_mode<synchronous>, transform_indices = @transform_4, window_bounds = array<i64: 1, 1>}, {transform_indices = @transform_5, window_bounds = array<i64: 8, 1>}]} {
    %c0 = arith.constant 0 : index
    %c0_0 = arith.constant 0 : index
    %c0_1 = arith.constant 0 : index
    %0 = vector.load %arg1[%c0, %c0_0, %c0_1] : memref<8x8x64xf32, #tpu.memory_space<vmem>>, vector<8x8x64xf32>
    %c0_2 = arith.constant 0 : index
    %c0_3 = arith.constant 0 : index
    %1 = vector.load %arg2[%c0_2, %c0_3] : memref<1x64xf32, #tpu.memory_space<vmem>>, vector<1x64xf32>
    %2 = vector.shape_cast %1 : vector<1x64xf32> to vector<1x1x64xf32>
    %3 = vector.broadcast %2 : vector<1x1x64xf32> to vector<8x8x64xf32>
    %4 = arith.mulf %0, %3 : vector<8x8x64xf32>
    %cst = arith.constant dense<0.000000e+00> : vector<8x8xf32>
    %5 = vector.multi_reduction <add>, %4, %cst [2] : vector<8x8x64xf32> to vector<8x8xf32>
    %c0_4 = arith.constant 0 : index
    %c0_5 = arith.constant 0 : index
    %6 = vector.load %arg3[%c0_4, %c0_5] : memref<1x1xf32, #tpu.memory_space<vmem>>, vector<1x1xf32>
    %7 = vector.broadcast %6 : vector<1x1xf32> to vector<8x8xf32>
    %8 = arith.addf %5, %7 : vector<8x8xf32>
    %cst_6 = arith.constant dense<0xFF800000> : vector<8xf32>
    %9 = vector.multi_reduction <maximumf>, %8, %cst_6 [1] : vector<8x8xf32> to vector<8xf32>
    %10 = vector.shape_cast %9 : vector<8xf32> to vector<8x1xf32>
    %11 = vector.broadcast %10 : vector<8x1xf32> to vector<8x8xf32>
    %12 = arith.subf %8, %11 : vector<8x8xf32>
    %13 = math.exp %12 : vector<8x8xf32>
    %cst_7 = arith.constant dense<0.000000e+00> : vector<8xf32>
    %14 = vector.multi_reduction <add>, %13, %cst_7 [1] : vector<8x8xf32> to vector<8xf32>
    %15 = vector.shape_cast %14 : vector<8xf32> to vector<8x1xf32>
    %16 = vector.broadcast %15 : vector<8x1xf32> to vector<8x8xf32>
    %17 = arith.divf %13, %16 : vector<8x8xf32>
    %18 = vector.shape_cast %17 : vector<8x8xf32> to vector<8x8x1xf32>
    %19 = vector.broadcast %18 : vector<8x8x1xf32> to vector<8x8x64xf32>
    %20 = arith.mulf %0, %19 : vector<8x8x64xf32>
    %cst_8 = arith.constant dense<0.000000e+00> : vector<8x64xf32>
    %21 = vector.multi_reduction <add>, %20, %cst_8 [1] : vector<8x8x64xf32> to vector<8x64xf32>
    %c0_9 = arith.constant 0 : index
    %c0_10 = arith.constant 0 : index
    %22 = vector.load %arg4[%c0_9, %c0_10] : memref<1x64xf32, #tpu.memory_space<vmem>>, vector<1x64xf32>
    %23 = vector.broadcast %22 : vector<1x64xf32> to vector<8x64xf32>
    %24 = arith.mulf %21, %23 : vector<8x64xf32>
    %cst_11 = arith.constant dense<0.000000e+00> : vector<8xf32>
    %25 = vector.multi_reduction <add>, %24, %cst_11 [1] : vector<8x64xf32> to vector<8xf32>
    %26 = vector.shape_cast %25 : vector<8xf32> to vector<8x1xf32>
    %c0_12 = arith.constant 0 : index
    %c0_13 = arith.constant 0 : index
    %27 = vector.load %arg5[%c0_12, %c0_13] : memref<1x1xf32, #tpu.memory_space<vmem>>, vector<1x1xf32>
    %28 = vector.broadcast %27 : vector<1x1xf32> to vector<8x1xf32>
    %29 = arith.addf %26, %28 : vector<8x1xf32>
    %c0_14 = arith.constant 0 : index
    %c0_15 = arith.constant 0 : index
    %30 = vector.load %arg6[%c0_14, %c0_15] : memref<8x1xf32, #tpu.memory_space<vmem>>, vector<8x1xf32>
    tpu.vector_store %arg6[%c0_14, %c0_15], %29 {strides = array<i32>} : memref<8x1xf32, #tpu.memory_space<vmem>>, vector<8x1xf32>,
    return
  }
  func.func @transform_0(%arg0: i32) -> (i32, i32, i32) {
    %c0_i32 = arith.constant 0 : i32
    %c0_i32_0 = arith.constant 0 : i32
    %c0_i32_1 = arith.constant 0 : i32
    return %arg0, %c0_i32, %c0_i32_0 : i32, i32, i32
  }
  func.func @transform_1(%arg0: i32) -> (i32, i32) {
    %c0_i32 = arith.constant 0 : i32
    %c0_i32_0 = arith.constant 0 : i32
    %c0_i32_1 = arith.constant 0 : i32
    return %c0_i32, %c0_i32_0 : i32, i32
  }
  func.func @transform_2(%arg0: i32) -> (i32, i32) {
    %c0_i32 = arith.constant 0 : i32
    %c0_i32_0 = arith.constant 0 : i32
    %c0_i32_1 = arith.constant 0 : i32
    return %c0_i32, %c0_i32_0 : i32, i32
  }
  func.func @transform_3(%arg0: i32) -> (i32, i32) {
    %c0_i32 = arith.constant 0 : i32
    %c0_i32_0 = arith.constant 0 : i32
    %c0_i32_1 = arith.constant 0 : i32
    return %c0_i32, %c0_i32_0 : i32, i32
  }
  func.func @transform_4(%arg0: i32) -> (i32, i32) {
    %c0_i32 = arith.constant 0 : i32
    %c0_i32_0 = arith.constant 0 : i32
    %c0_i32_1 = arith.constant 0 : i32
    return %c0_i32, %c0_i32_0 : i32, i32
  }
  func.func @transform_5(%arg0: i32) -> (i32, i32) {
    %c0_i32 = arith.constant 0 : i32
    %c0_i32_0 = arith.constant 0 : i32
    return %arg0, %c0_i32 : i32, i32
  }
}

</mosaic_0001>

<bundles_post_ra>
// kernel: stock_lstm_forward.5
= control target key start
LH: loop header
LB: loop body
LE: loop exit
PB: predicated region body
PF: predicated region fallthrough
CT: control target
= control target key end

     0   :  { %vm47_vm0 = vcmask 523264   ;;  %v546_v3 = vmov 0   ;;  %v98_v33 = vlaneseq  ;;  %vm132_vm1 = vcmask 1041409   ;;  %s773_s0 = inlined_call_operand.vmem [shape: f32[8,8,64], index: 0, kind: input, shape index: {}]   ;;  %s774_s1 = inlined_call_operand.vmem [shape: f32[1,64], index: 1, kind: input, shape index: {}]   ;;  %s775_s2 = inlined_call_operand.<no memory space> [shape: f32[1,1], index: 2, kind: input, shape index: {}]   ;;  %s776_s4 = inlined_call_operand.<no memory space> [shape: f32[1,1], index: 4, kind: input, shape index: {}]   ;;  %s777_s3 = inlined_call_operand.vmem [shape: f32[1,64], index: 3, kind: input, shape index: {}]   ;;  %s778_s5 = inlined_call_operand.vmem [shape: f32[8,1], index: 5, kind: output, shape index: {}]  }
   0x1   :  { %v580_v0 = vld [vmem:[%s773_s0] sm:$0xff]  ;;  %v588_v2 = vld [vmem:[%s773_s0 + $0x8] sm:$0xff]  ;;  %512 = vset.pattern.permute.xlu0 %v546_v3  ;;  %v10_v4 = vstv %s775_s2  ;;  %513 = vset.pattern.permute.xlu1 %v546_v3  ;;  %v598_v7 = vld [vmem:[%s773_s0 + $0x10] sm:$0xff]  ;;  %vm134_vm2 = vcmask 1042434   ;;  %vm136_vm3 = vcmask 1043459   ;;  %vm138_vm4 = vcmask 1044484  }
   0x2   :  { %v507_v1 = vld [vmem:[%s774_s1] ss:$0 sm:$0xff]  ;;  %v603_v8 = vld [vmem:[%s773_s0 + $0x18] sm:$0xff]  ;;  %11 = vst [vmem:[#allocation2] sm:$0x1] %v10_v4  ;;  %v616_v13 = vld [vmem:[%s773_s0 + $0x28] sm:$0xff] }
   0x3   :  { %v39_v5 = vmul.f32 %v507_v1, %v580_v0  ;;  %v40_v6 = vmul.f32 %v507_v1, %v588_v2  ;;  %v41_v9 = vmul.f32 %v507_v1, %v598_v7  ;;  %v609_v10 = vld [vmem:[%s773_s0 + $0x20] sm:$0xff]  ;;  %v42_v11 = vmul.f32 %v507_v1, %v603_v8  ;;  %v625_v18 = vld [vmem:[%s773_s0 + $0x30] sm:$0xff]  ;;  %v631_v20 = vld [vmem:[%s773_s0 + $0x38] sm:$0xff] }
   0x4   :  { %v43_v16 = vmul.f32 %v507_v1, %v609_v10  ;;  %v44_v19 = vmul.f32 %v507_v1, %v616_v13  ;;  %v45_v22 = vmul.f32 %v507_v1, %v625_v18  ;;  %v46_v24 = vmul.f32 %v507_v1, %v631_v20 }
   0x5   :  { %v48_v12 = vsel %vm47_vm0, %v39_v5, 0.0  ;;  %v54_v14 = vsel %vm47_vm0, %v41_v9, 0.0  ;;  %v51_v15 = vsel %vm47_vm0, %v40_v6, 0.0  ;;  %v57_v17 = vsel %vm47_vm0, %v42_v11, 0.0 }
   0x6   :  { %49 = vadd.xlane.f32.xlu0 %v48_v12  ;;  %55 = vadd.xlane.f32.xlu1 %v54_v14  ;;  %v60_v21 = vsel %vm47_vm0, %v43_v16, 0.0  ;;  %v63_v23 = vsel %vm47_vm0, %v44_v19, 0.0  ;;  %v66_v25 = vsel %vm47_vm0, %v45_v22, 0.0  ;;  %v69_v26 = vsel %vm47_vm0, %v46_v24, 0.0 }
   0x7   :  { %v99_v34 = vand.u32 127, %v98_v33  ;;  %v639_v35 = vshrl.u32 %v98_v33, 7  ;;  %vm140_vm5 = vcmask 1045509   ;;  %vm142_vm6 = vcmask 1046534  }
   0x8   :  { %vm144_vm7 = vcmask 1047559   ;;  %vm147_vm8 = vcmask 64512   ;;  %vm501_vm9 = vcmask 7168  }
   0x9   :  { %v508_v27 = vld [vmem:[#allocation2] ss:$0 sm:$0xff]  ;;  %v642_v38 = vsub.s32 %v99_v34, %v639_v35  ;;  %v154_v3 = vsub.s32 0, %v639_v35  ;;  %v158_v4 = vsub.s32 1, %v639_v35  ;;  %v182_v5 = vsub.s32 7, %v639_v35 }
   0xa   :  { %52 = vadd.xlane.f32.xlu0 %v51_v15  ;;  %58 = vadd.xlane.f32.xlu1 %v57_v17  ;;  %v162_v6 = vsub.s32 2, %v639_v35  ;;  %v166_v15 = vsub.s32 3, %v639_v35  ;;  %v170_v22 = vsub.s32 4, %v639_v35 }
   0xe   :  { %61 = vadd.xlane.f32.xlu0 %v60_v21  ;;  %64 = vadd.xlane.f32.xlu1 %v63_v23 }
  0x12   :  { %67 = vadd.xlane.f32.xlu0 %v66_v25  ;;  %70 = vadd.xlane.f32.xlu1 %v69_v26 }
  0x28   :  { %79 = vperm.xlu0 %512, %v508_v27   ;;  %v174_v27 = vsub.s32 5, %v639_v35 }
  0x8f   :  { %v50_v28 = vpop.xlane.xlu0 %49  ;;  %v56_v30 = vpop.xlane.xlu1 %55 }
  0x93   :  { %v53_v29 = vpop.xlane.xlu0 %52  ;;  %v59_v32 = vpop.xlane.xlu1 %58 }
  0x97   :  { %v62_v31 = vpop.xlane.xlu0 %61  ;;  %v65_v37 = vpop.xlane.xlu1 %64 }
  0x9b   :  { %v68_v36 = vpop.xlane.xlu0 %67  ;;  %v71_v44 = vpop.xlane.xlu1 %70 }
  0xa3   :  { %v80_v39 = vpop.permute.xlu0 %79 }
  0xa4   :  { %v82_v40 = vadd.f32 %v80_v39, %v50_v28  ;;  %v83_v41 = vadd.f32 %v80_v39, %v53_v29  ;;  %v84_v42 = vadd.f32 %v80_v39, %v56_v30  ;;  %v85_v43 = vadd.f32 %v80_v39, %v59_v32 }
  0xa5   :  { %v644_v45 = vadd.f32 %v80_v39, %v62_v31  ;;  %v646_v46 = vadd.f32 %v80_v39, %v65_v37  ;;  %v651_v50 = vadd.f32 %v80_v39, %v68_v36  ;;  %v89_v51 = vadd.f32 %v80_v39, %v71_v44 }
  0xa6   :  { %v103_v47 = vrot.slane %v82_v40, %v642_v38  ;;  %v107_v48 = vrot.slane %v83_v41, %v642_v38  ;;  %v111_v49 = vrot.slane %v84_v42, %v642_v38  ;;  %v115_v52 = vrot.slane %v85_v43, %v642_v38 }
  0xa7   :  { %v119_v54 = vrot.slane %v644_v45, %v642_v38  ;;  %v123_v56 = vrot.slane %v646_v46, %v642_v38  ;;  %v127_v58 = vrot.slane %v651_v50, %v642_v38  ;;  %v131_v60 = vrot.slane %v89_v51, %v642_v38 }
  0xa8   :  { %v133_v53 = vsel %vm132_vm1, %v107_v48, %v103_v47  ;;  %v178_v32 = vsub.s32 6, %v639_v35 }
  0xa9   :  { %v135_v55 = vsel %vm134_vm2, %v111_v49, %v133_v53 }
  0xaa   :  { %v137_v57 = vsel %vm136_vm3, %v115_v52, %v135_v55 }
  0xab   :  { %v139_v59 = vsel %vm138_vm4, %v119_v54, %v137_v57 }
  0xac   :  { %v141_v61 = vsel %vm140_vm5, %v123_v56, %v139_v59 }
  0xad   :  { %v143_v62 = vsel %vm142_vm6, %v127_v58, %v141_v61 }
  0xae   :  { %v145_v63 = vsel %vm144_vm7, %v131_v60, %v143_v62 }
  0xaf   :  { %v148_v1 = vsel %vm147_vm8, %v145_v63, -inf }
  0xb0   :  { %149 = vmax.xlane.f32.xlu1 %v148_v1 }
 0x139   :  { %v150_v9 = vpop.xlane.xlu1 %149 }
 0x13a   :  { %v155_v11 = vrot.slane %v150_v9, %v154_v3  ;;  %v159_v12 = vrot.slane %v150_v9, %v158_v4  ;;  %v183_v14 = vrot.slane %v150_v9, %v182_v5  ;;  %v163_v16 = vrot.slane %v150_v9, %v162_v6 }
 0x13b   :  { %v167_v24 = vrot.slane %v150_v9, %v166_v15  ;;  %v171_v29 = vrot.slane %v150_v9, %v170_v22  ;;  %v175_v33 = vrot.slane %v150_v9, %v174_v27  ;;  %v179_v37 = vrot.slane %v150_v9, %v178_v32 }
 0x13c   :  { %v192_v17 = vsub.f32 %v82_v40, %v155_v11  ;;  %v193_v19 = vsub.f32 %v83_v41, %v159_v12  ;;  %v199_v23 = vsub.f32 %v89_v51, %v183_v14  ;;  %v194_v25 = vsub.f32 %v84_v42, %v163_v16 }
 0x13d   :  { %v195_v30 = vsub.f32 %v85_v43, %v167_v24  ;;  %v196_v34 = vsub.f32 %v644_v45, %v171_v29  ;;  %v197_v39 = vsub.f32 %v646_v46, %v175_v33  ;;  %v198_v42 = vsub.f32 %v651_v50, %v179_v37 }
 0x13e   :  { %v200_v21 = vmul.f32 1.442695, %v192_v17  ;;  %v202_v26 = vmul.f32 1.442695, %v193_v19  ;;  %v214_v28 = vmul.f32 1.442695, %v199_v23 }
 0x13f   :  { %v204_v31 = vmul.f32 1.442695, %v194_v25  ;;  %v206_v36 = vmul.f32 1.442695, %v195_v30  ;;  %v208_v40 = vmul.f32 1.442695, %v196_v34 }
 0x140   :  { %514 = vpow2.f32 %v200_v21  ;;  %v210_v43 = vmul.f32 1.442695, %v197_v39  ;;  %v212_v47 = vmul.f32 1.442695, %v198_v42 }
 0x141   :  { %516 = vpow2.f32 %v202_v26 }
 0x142   :  { %518 = vpow2.f32 %v214_v28 }
 0x143   :  { %520 = vpow2.f32 %v204_v31 }
 0x144   :  { %522 = vpow2.f32 %v206_v36 }
 0x145   :  { %524 = vpow2.f32 %v208_v40 }
 0x146   :  { %526 = vpow2.f32 %v210_v43 }
 0x147   :  { %528 = vpow2.f32 %v212_v47 }
 0x14d   :  { %v695_v41 = vpop.eup %514 }
 0x14e   :  { %225 = vperm.xlu1 %513, %v695_v41   ;;  %v517_v44 = vpop.eup %516 }
 0x14f   :  { %v699_v45 = vpop.eup %518 }
 0x150   :  { %v521_v48 = vpop.eup %520  ;;  %246 = vperm.xlu0 %512, %v699_v45  }
 0x151   :  { %v523_v46 = vpop.eup %522 }
 0x152   :  { %228 = vperm.xlu1 %513, %v517_v44   ;;  %v525_v49 = vpop.eup %524 }
 0x153   :  { %v527_v51 = vpop.eup %526 }
 0x154   :  { %v702_v50 = vpop.eup %528 }
 0x156   :  { %231 = vperm.xlu1 %513, %v521_v48  }
 0x15a   :  { %234 = vperm.xlu1 %513, %v523_v46  }
 0x15e   :  { %237 = vperm.xlu1 %513, %v525_v49  }
 0x162   :  { %240 = vperm.xlu1 %513, %v527_v51  }
 0x166   :  { %243 = vperm.xlu1 %513, %v702_v50  }
 0x1c9   :  { %v226_v52 = vpop.permute.xlu1 %225 }
 0x1ca   :  { %v251_v59 = vrot.slane %v226_v52, %v642_v38 }
 0x1cb   :  { %v247_v9 = vpop.permute.xlu0 %246 }
 0x1cc   :  { %v279_v19 = vrot.slane %v247_v9, %v642_v38 }
 0x1cd   :  { %v229_v53 = vpop.permute.xlu1 %228 }
 0x1ce   :  { %v255_v57 = vrot.slane %v229_v53, %v642_v38 }
 0x1d0   :  { %v280_v63 = vsel %vm132_vm1, %v255_v57, %v251_v59 }
 0x1d1   :  { %v232_v54 = vpop.permute.xlu1 %231 }
 0x1d2   :  { %v259_v58 = vrot.slane %v232_v54, %v642_v38 }
 0x1d4   :  { %v281_v11 = vsel %vm134_vm2, %v259_v58, %v280_v63 }
 0x1d5   :  { %v235_v55 = vpop.permute.xlu1 %234 }
 0x1d6   :  { %v263_v60 = vrot.slane %v235_v55, %v642_v38 }
 0x1d8   :  { %v282_v12 = vsel %vm136_vm3, %v263_v60, %v281_v11 }
 0x1d9   :  { %v238_v56 = vpop.permute.xlu1 %237 }
 0x1da   :  { %v267_v62 = vrot.slane %v238_v56, %v642_v38 }
 0x1dc   :  { %v283_v16 = vsel %vm138_vm4, %v267_v62, %v282_v12 }
 0x1dd   :  { %v241_v61 = vpop.permute.xlu1 %240 }
 0x1de   :  { %v271_v1 = vrot.slane %v241_v61, %v642_v38 }
 0x1e0   :  { %v284_v21 = vsel %vm140_vm5, %v271_v1, %v283_v16 }
 0x1e1   :  { %v244_v14 = vpop.permute.xlu1 %243 }
 0x1e2   :  { %v275_v17 = vrot.slane %v244_v14, %v642_v38 }
 0x1e4   :  { %v285_v23 = vsel %vm142_vm6, %v275_v17, %v284_v21 }
 0x1e5   :  { %v286_v24 = vsel %vm144_vm7, %v279_v19, %v285_v23 }
 0x1e6   :  { %v288_v25 = vsel %vm147_vm8, %v286_v24, 0.0 }
 0x1e7   :  { %289 = vadd.xlane.f32.xlu1 %v288_v25 }
 0x270   :  { %v290_v26 = vpop.xlane.xlu1 %289 }
 0x271   :  { %v299_v28 = vrot.slane %v290_v26, %v158_v4  ;;  %v303_v29 = vrot.slane %v290_v26, %v162_v6  ;;  %v295_v38 = vrot.slane %v290_v26, %v154_v3  ;;  %v307_v30 = vrot.slane %v290_v26, %v166_v15 }
 0x272   :  { %v311_v31 = vrot.slane %v290_v26, %v170_v22  ;;  %v315_v4 = vrot.slane %v290_v26, %v174_v27  ;;  %v319_v3 = vrot.slane %v290_v26, %v178_v32  ;;  %v323_v15 = vrot.slane %v290_v26, %v182_v5 }
 0x273   :  { %530 = vrcp.f32 %v299_v28  ;;  %v12_v5 = vstv %s776_s4 }
 0x274   :  { %532 = vrcp.f32 %v303_v29  ;;  %13 = vst [vmem:[#allocation3] sm:$0x1] %v12_v5 }
 0x275   :  { %534 = vrcp.f32 %v295_v38 }
 0x276   :  { %536 = vrcp.f32 %v307_v30 }
 0x277   :  { %538 = vrcp.f32 %v311_v31 }
 0x278   :  { %540 = vrcp.f32 %v315_v4 }
 0x279   :  { %542 = vrcp.f32 %v319_v3 }
 0x27a   :  { %544 = vrcp.f32 %v323_v15 }
 0x280   :  { %v531_v33 = vpop.eup %530 }
 0x281   :  { %v335_v34 = vmul.f32 %v531_v33, %v517_v44  ;;  %v533_v6 = vpop.eup %532 }
 0x282   :  { %v337_v36 = vmul.f32 %v533_v6, %v521_v48  ;;  %v535_v37 = vpop.eup %534 }
 0x283   :  { %355 = vperm.xlu0 %512, %v335_v34   ;;  %v333_v22 = vmul.f32 %v535_v37, %v695_v41  ;;  %v537_v39 = vpop.eup %536 }
 0x284   :  { %v339_v27 = vmul.f32 %v537_v39, %v523_v46  ;;  %v539_v40 = vpop.eup %538 }
 0x285   :  { %v341_v42 = vmul.f32 %v539_v40, %v525_v49  ;;  %v541_v43 = vpop.eup %540 }
 0x286   :  { %v343_v32 = vmul.f32 %v541_v43, %v527_v51  ;;  %v543_v44 = vpop.eup %542 }
 0x287   :  { %360 = vperm.xlu0 %512, %v337_v36   ;;  %v345_v47 = vmul.f32 %v543_v44, %v702_v50  ;;  %v545_v48 = vpop.eup %544 }
 0x288   :  { %v347_v35 = vmul.f32 %v545_v48, %v699_v45 }
 0x28b   :  { %350 = vperm.xlu0 %512, %v333_v22  }
 0x28f   :  { %365 = vperm.xlu0 %512, %v339_v27  }
 0x293   :  { %370 = vperm.xlu0 %512, %v341_v42  }
 0x297   :  { %375 = vperm.xlu0 %512, %v343_v32  }
 0x29b   :  { %380 = vperm.xlu0 %512, %v345_v47  }
 0x29f   :  { %385 = vperm.xlu0 %512, %v347_v35  }
 0x2fe   :  { %v356_v41 = vpop.permute.xlu0 %355 }
 0x2ff   :  { %v389_v46 = vmul.f32 %v356_v41, %v588_v2 }
 0x301   :  { %v403_v52 = vsel %vm47_vm0, %v389_v46, 0.0 }
 0x302   :  { %v361_v49 = vpop.permute.xlu0 %360  ;;  %v404_v54 = vrot.slane %v403_v52, 4 }
 0x303   :  { %v390_v51 = vmul.f32 %v361_v49, %v598_v7 }
 0x304   :  { %v405_v60 = vadd.f32 %v404_v54, %v403_v52 }
 0x305   :  { %v410_v45 = vsel %vm47_vm0, %v390_v51, 0.0 }
 0x306   :  { %v351_v53 = vpop.permute.xlu0 %350  ;;  %v411_v58 = vrot.slane %v410_v45, 4 }
 0x307   :  { %v388_v50 = vmul.f32 %v351_v53, %v580_v0  ;;  %v406_v0 = vrot.slane %v405_v60, 2 }
 0x308   :  { %v412_v63 = vadd.f32 %v411_v58, %v410_v45 }
 0x309   :  { %v396_v55 = vsel %vm47_vm0, %v388_v50, 0.0  ;;  %v407_v21 = vadd.f32 %v406_v0, %v405_v60 }
 0x30a   :  { %v397_v56 = vrot.slane %v396_v55, 4  ;;  %v366_v57 = vpop.permute.xlu0 %365  ;;  %v413_v19 = vrot.slane %v412_v63, 2 }
 0x30b   :  { %v391_v59 = vmul.f32 %v366_v57, %v603_v8  ;;  %v408_v31 = vrot.slane %v407_v21, 1 }
 0x30c   :  { %v398_v2 = vadd.f32 %v397_v56, %v396_v55  ;;  %v414_v38 = vadd.f32 %v413_v19, %v412_v63 }
 0x30d   :  { %v417_v61 = vsel %vm47_vm0, %v391_v59, 0.0  ;;  %v409_v27 = vadd.f32 %v408_v31, %v407_v21 }
 0x30e   :  { %v418_v7 = vrot.slane %v417_v61, 4  ;;  %v371_v62 = vpop.permute.xlu0 %370  ;;  %v399_v11 = vrot.slane %v398_v2, 2  ;;  %v415_v15 = vrot.slane %v414_v38, 1 }
 0x30f   :  { %v392_v1 = vmul.f32 %v371_v62, %v609_v10 }
 0x310   :  { %v419_v9 = vadd.f32 %v418_v7, %v417_v61  ;;  %v400_v24 = vadd.f32 %v399_v11, %v398_v2  ;;  %v416_v5 = vadd.f32 %v415_v15, %v414_v38 }
 0x311   :  { %v424_v12 = vsel %vm47_vm0, %v392_v1, 0.0 }
 0x312   :  { %v420_v14 = vrot.slane %v419_v9, 2  ;;  %v425_v16 = vrot.slane %v424_v12, 4  ;;  %v376_v17 = vpop.permute.xlu0 %375  ;;  %v401_v34 = vrot.slane %v400_v24, 1 }
 0x313   :  { %v393_v8 = vmul.f32 %v376_v17, %v616_v13 }
 0x314   :  { %v426_v23 = vadd.f32 %v425_v16, %v424_v12  ;;  %v421_v26 = vadd.f32 %v420_v14, %v419_v9  ;;  %v402_v43 = vadd.f32 %v401_v34, %v400_v24  ;;  %v510_v24 = vld [vmem:[#allocation3] ss:$0 sm:$0xff] }
 0x315   :  { %v431_v25 = vsel %vm47_vm0, %v393_v8, 0.0 }
 0x316   :  { %v427_v28 = vrot.slane %v426_v23, 2  ;;  %v432_v29 = vrot.slane %v431_v25, 4  ;;  %v381_v10 = vpop.permute.xlu0 %380  ;;  %v422_v3 = vrot.slane %v421_v26, 1 }
 0x317   :  { %v394_v30 = vmul.f32 %v381_v10, %v625_v18  ;;  %v509_v18 = vld [vmem:[%s777_s3] ss:$0 sm:$0xff] }
 0x318   :  { %v428_v33 = vadd.f32 %v427_v28, %v426_v23  ;;  %v433_v4 = vadd.f32 %v432_v29, %v431_v25  ;;  %v423_v44 = vadd.f32 %v422_v3, %v421_v26  ;;  %v460_v46 = vmul.f32 %v509_v18, %v409_v27 }
 0x319   :  { %v438_v6 = vsel %vm47_vm0, %v394_v30, 0.0  ;;  %v459_v52 = vmul.f32 %v509_v18, %v402_v43  ;;  %v461_v45 = vmul.f32 %v509_v18, %v416_v5 }
 0x31a   :  { %v434_v13 = vrot.slane %v433_v4, 2  ;;  %v439_v36 = vrot.slane %v438_v6, 4  ;;  %v386_v37 = vpop.permute.xlu0 %385  ;;  %v429_v22 = vrot.slane %v428_v33, 1  ;;  %v462_v53 = vmul.f32 %v509_v18, %v423_v44 }
 0x31b   :  { %v395_v39 = vmul.f32 %v386_v37, %v631_v20  ;;  %v475_v56 = vrot.slane %v460_v46, 7  ;;  %v477_v62 = vrot.slane %v461_v45, 6 }
 0x31c   :  { %v435_v40 = vadd.f32 %v434_v13, %v433_v4  ;;  %v440_v42 = vadd.f32 %v439_v36, %v438_v6  ;;  %v430_v41 = vadd.f32 %v429_v22, %v428_v33  ;;  %v479_v2 = vrot.slane %v462_v53, 5 }
 0x31d   :  { %v445_v32 = vsel %vm47_vm0, %v395_v39, 0.0  ;;  %v476_v60 = vsel %vm132_vm1, %v475_v56, %v459_v52 }
 0x31e   :  { %v436_v47 = vrot.slane %v435_v40, 1  ;;  %v441_v48 = vrot.slane %v440_v42, 2  ;;  %v446_v35 = vrot.slane %v445_v32, 4  ;;  %v463_v55 = vmul.f32 %v509_v18, %v430_v41 }
 0x31f   :  { %v478_v9 = vsel %vm134_vm2, %v477_v62, %v476_v60 }
 0x320   :  { %v437_v49 = vadd.f32 %v436_v47, %v435_v40  ;;  %v442_v51 = vadd.f32 %v441_v48, %v440_v42  ;;  %v447_v20 = vadd.f32 %v446_v35, %v445_v32  ;;  %v481_v63 = vrot.slane %v463_v55, 4 }
 0x321   :  { %v480_v14 = vsel %vm136_vm3, %v479_v2, %v478_v9 }
 0x322   :  { %v443_v50 = vrot.slane %v442_v51, 1  ;;  %v448_v54 = vrot.slane %v447_v20, 2  ;;  %v464_v57 = vmul.f32 %v509_v18, %v437_v49  ;;  %v482_v16 = vsel %vm138_vm4, %v481_v63, %v480_v14 }
 0x324   :  { %v444_v58 = vadd.f32 %v443_v50, %v442_v51  ;;  %v449_v59 = vadd.f32 %v448_v54, %v447_v20  ;;  %v483_v1 = vrot.slane %v464_v57, 3 }
 0x326   :  { %v450_v61 = vrot.slane %v449_v59, 1  ;;  %v465_v7 = vmul.f32 %v509_v18, %v444_v58  ;;  %v484_v17 = vsel %vm140_vm5, %v483_v1, %v482_v16 }
 0x328   :  { %v451_v0 = vadd.f32 %v450_v61, %v449_v59  ;;  %v485_v11 = vrot.slane %v465_v7, 2 }
 0x32a   :  { %v466_v12 = vmul.f32 %v509_v18, %v451_v0  ;;  %v486_v8 = vsel %vm142_vm6, %v485_v11, %v484_v17 }
 0x32c   :  { %v487_v19 = vrot.slane %v466_v12, 1 }
 0x32e   :  { %v488_v21 = vsel %vm144_vm7, %v487_v19, %v486_v8 }
 0x32f   :  { %v490_v23 = vsel %vm47_vm0, %v488_v21, 0.0 }
 0x330   :  { %491 = vadd.xlane.f32.xlu0 %v490_v23 }
 0x3b9   :  { %v492_v25 = vpop.xlane.xlu0 %491 }
 0x3ba   :  { %v500_v26 = vadd.f32 %v510_v24, %v492_v25 }
 0x3bc   :  { %502 = vst.msk [vmem:[%s778_s5] sm:$0xff] %vm501_vm9, %v500_v26 }

// kernel: stock_lstm_forward.3
= control target key start
LH: loop header
LB: loop body
LE: loop exit
PB: predicated region body
PF: predicated region fallthrough
CT: control target
= control target key end

     0   :  { %s1040_s30 = smov 0   ;;  %s1132_s0 = inlined_call_operand.vmem [shape: f32[8,8,8], index: 0, kind: input, shape index: {}, may-alias: {0,1}]   ;;  %s1133_s1 = inlined_call_operand.vmem [shape: f32[8,8,8], index: 1, kind: input, shape index: {}, may-alias: {0,1}]   ;;  %s1134_s2 = inlined_call_operand.vmem [shape: f32[8,128], index: 2, kind: input, shape index: {}]   ;;  %s1135_s3 = inlined_call_operand.vmem [shape: f32[32,128], index: 3, kind: input, shape index: {}]   ;;  %s1136_s4 = inlined_call_operand.vmem [shape: f32[1,128], index: 4, kind: input, shape index: {}]   ;;  %s1137_s5 = inlined_call_operand.vmem [shape: f32[8,128], index: 5, kind: input, shape index: {}]   ;;  %s1138_s6 = inlined_call_operand.vmem [shape: f32[32,128], index: 6, kind: input, shape index: {}]   ;;  %s1139_s7 = inlined_call_operand.vmem [shape: f32[1,128], index: 7, kind: input, shape index: {}]   ;;  %s1140_s8 = inlined_call_operand.vmem [shape: f32[8,8,32], index: 8, kind: output, shape index: {0}]   ;;  %s1141_s9 = inlined_call_operand.vmem [shape: f32[8,8,32], index: 9, kind: output, shape index: {1}]  }
   0x1 LB: > { %s880_s10 = sadd.s32 4294967295, %s982_s30   ;;  %p884_p0 = scmp.ge.s32.totalorder %s982_s30, 1  ;;  %s982_s30 = sphi %s1040_s30, %s20_s30  }
   0x2   : > { %p304_p1 = scmp.lt.s32.totalorder %s982_s30, 9 }
   0x4   : > { %p305_p2 = pnand %p884_p0, %p304_p1 }
   0x5   : > { %p348_p3 = scmp.lt.s32.totalorder (!%p305_p2), %s880_s10, 7  ;;  %s352_s11 = ssub.s32 (!%p305_p2), 7, %s880_s10 }
   0x6   : > { %308 = sbr.rel (%p305_p2) target bundleno = 726 (0x2d6), region = 52  ;;  %p353_p4 = scmp.lt.s32.totalorder (!%p305_p2), %s352_s11, 7 }
   0x7   : > { %p889_p5 = scmp.ne.s32.totalorder (!%p305_p2), %s880_s10, 0 }
   0xb   : > { %s349_s12 = scalar_select %p348_p3, %s880_s10, 7 }
   0xc   : > { %s1143_s11 = smov (!%p353_p4, %s352_s11), 7  ;;  %371 = sbr.rel (%p889_p5) target bundleno = 20 (0x14), region = 56 }
   0xd   : > { %s885_s13 = sshll.u32 %s349_s12, 3  ;;  %s886_s17 = sshll.u32 %s1143_s11, 3 }
   0xe   : > { %s351_s16 = scalar_lea.vmem %s1132_s0, %s885_s13  ;;  %s1054_s20 = scalar_lea.vmem %s1133_s1, %s886_s17 }
   0xf   : > { %s1059_s23 = scalar_lea.vmem %s1140_s8, %s885_s13  ;;  %s1064_s26 = scalar_lea.vmem %s1141_s9, %s886_s17 }
  0x11   : > { %vm372_vm0 = vcmask 261120   ;;  %v984_v0 = vmov 0.0  }
  0x12   : > { %373 = vst.msk [vmem:[#allocation2] sm:$0xff] %vm372_vm0, %v984_v0  ;;  %374 = vst.msk [vmem:[#allocation3] sm:$0xff] %vm372_vm0, %v984_v0 }
  0x13   : > { %375 = vst.msk [vmem:[#allocation4] sm:$0xff] %vm372_vm0, %v984_v0  ;;  %376 = vst.msk [vmem:[#allocation5] sm:$0xff] %vm372_vm0, %v984_v0 }
  0x14 PF: > { %v384_v1 = vld [vmem:[%s1135_s3 + $0x18] sm:$0xff]  ;;  %v380_v2 = vld [vmem:[%s1134_s2] sm:$0xff]  ;;  %v985_v3 = vmov 0.0   ;;  %v383_v4 = vld [vmem:[%s1135_s3 + $0x10] sm:$0xff]  ;;  %vm459_vm1 = vcmask 64512   ;;  %vm986_vm2 = vmmov 0  }
  0x15   : > { %914 = vmatprep.subr.mxu0 %v985_v3  ;;  %925 = vmatprep.subr.mxu1 %v985_v3  ;;  %v377_v5 = vld [vmem:[%s351_s16] sm:$0xff]  ;;  %v587_v6 = vld [vmem:[%s1138_s6 + $0x18] sm:$0xff]  ;;  %v382_v7 = vld [vmem:[%s1135_s3 + $0x8] sm:$0xff]  ;;  %vm385_vm3 = vcmask 261120   ;;  %s987_s11 = smov 32   ;;  %s988_s14 = smov 64  }
  0x16   : > { %915 = vmatpush3.msra.mxu0 %v384_v1  ;;  %926 = vmatpush3.msra.mxu1 %v380_v2  ;;  %v586_v8 = vld [vmem:[%s1138_s6 + $0x10] sm:$0xff]  ;;  %v381_v9 = vld [vmem:[%s1135_s3] sm:$0xff]  ;;  %v585_v11 = vld [vmem:[%s1138_s6 + $0x8] sm:$0xff]  ;;  %s989_s15 = smov 96  }
  0x17   : > { %916 = vmatprep.subr.mxu0 %v985_v3  ;;  %927 = vmatprep.mubr.msk.f32.mxu1 %vm986_vm2, %v985_v3  ;;  %v583_v12 = vld [vmem:[%s1137_s5] sm:$0xff] }
  0x18   : > { %917 = vmatpush3.msra.mxu0 %v383_v4  ;;  %930 = vmatprep.subr.mxu1 %v985_v3  ;;  %v584_v13 = vld [vmem:[%s1138_s6] sm:$0xff] }
  0x19   : > { %918 = vmatprep.subr.mxu0 %v985_v3  ;;  %928 = vmatmul.mubr.msk.f32.vlgmr.msra.gmra.mxu1 %vm459_vm1, %v377_v5  ;;  %v378_v10 = vld [vmem:[#allocation2] sm:$0xff]  ;;  %v379_v16 = vld [vmem:[#allocation3] sm:$0xff] }
  0x1a   : > { %931 = vmatpush3.msra.mxu1 %v587_v6  ;;  %919 = vmatpush3.msra.mxu0 %v382_v7  ;;  %v581_v14 = vld [vmem:[#allocation4] sm:$0xff]  ;;  %v580_v15 = vld [vmem:[%s1054_s20] sm:$0xff]  ;;  %v582_v17 = vld [vmem:[#allocation5] sm:$0xff] }
  0x1b   : > { %932 = vmatprep.subr.mxu1 %v985_v3  ;;  %920 = vmatprep.subr.mxu0 %v985_v3  ;;  %v892_v21 = vld [vmem:[%s1136_s4] ss:$0 sm:$0xff] }
  0x1c   : > { %933 = vmatpush3.msra.mxu1 %v586_v8  ;;  %921 = vmatpush3.msra.mxu0 %v381_v9  ;;  %v896_v27 = vld [vmem:[%s1139_s7] ss:$0 sm:$0xff] }
  0x1d   : > { %922 = vmatprep.mubr.msk.f32.mxu0 %vm986_vm2, %v985_v3  ;;  %934 = vmatprep.subr.mxu1 %v985_v3 }
  0x1e   : > { %923 = vmatmul.mubr.msk.f32.vlgmr.msra.gmra.mxu0 %vm385_vm3, %v378_v10  ;;  %935 = vmatpush3.msra.mxu1 %v585_v11 }
  0x1f   : > { %941 = vmatprep.subr.mxu0 %v985_v3  ;;  %936 = vmatprep.subr.mxu1 %v985_v3 }
  0x20   : > { %942 = vmatpush3.msra.mxu0 %v583_v12  ;;  %937 = vmatpush3.msra.mxu1 %v584_v13 }
  0x21   : > { %938 = vmatprep.mubr.msk.f32.mxu1 %vm986_vm2, %v985_v3  ;;  %943 = vmatprep.mubr.msk.f32.mxu0 %vm986_vm2, %v985_v3 }
  0x22   : > { %939 = vmatmul.mubr.msk.f32.vlgmr.msra.gmra.mxu1 %vm385_vm3, %v581_v14  ;;  %944 = vmatmul.mubr.msk.f32.vlgmr.msra.gmra.mxu0 %vm459_vm1, %v580_v15 }
  0x23   : > { %549 = vrot.lane.b32.xlu1 %v379_v16, %s987_s11 }
  0x27   : > { %750 = vrot.lane.b32.xlu1 %v582_v17, %s987_s11 }
  0x95   : > { %v550_v46 = vpop.permute.xlu1 %549 }
  0x99   : > { %v751_v48 = vpop.permute.xlu1 %750 }
  0xd9   : > { %v529_v18 = vpop.f32.mrf.mxu1 }
  0xdb   : > { %v929_v19 = vpop.f32.mrf.mxu1 }
  0xde   : > { %v455_v20 = vpop.f32.mrf.mxu0 }
  0xdf   : > { %v530_v22 = vadd.f32 %v529_v18, %v455_v20 }
  0xe0   : > { %v924_v23 = vpop.f32.mrf.mxu0 }
  0xe1   : > { %v540_v24 = vadd.f32 %v892_v21, %v530_v22 }
  0xe2   : > { %v657_v25 = vpop.f32.mrf.mxu1  ;;  %v730_v26 = vpop.f32.mrf.mxu0 }
  0xe3   : > { %960 = vtanh.f32 %v540_v24  ;;  %v731_v28 = vadd.f32 %v730_v26, %v657_v25  ;;  %v893_v34 = vmul.f32 -1.442695, %v540_v24 }
  0xe4   : > { %v940_v29 = vpop.f32.mrf.mxu1  ;;  %v945_v30 = vpop.f32.mrf.mxu0 }
  0xe5   : > { %v741_v31 = vadd.f32 %v896_v27, %v731_v28 }
  0xe7   : > { %962 = vtanh.f32 %v741_v31  ;;  %v897_v35 = vmul.f32 -1.442695, %v741_v31 }
  0xe8   : > { %964 = vpow2.f32 %v893_v34 }
  0xe9   : > { %966 = vpow2.f32 %v897_v35 }
  0xf0   : > { %v961_v32 = vpop.eup %960 }
  0xf1   : > { %554 = vrot.lane.b32.xlu0 %v961_v32, %s988_s14 }
  0xf4   : > { %v963_v33 = vpop.eup %962 }
  0xf5   : > { %755 = vrot.lane.b32.xlu0 %v963_v33, %s988_s14  ;;  %v965_v36 = vpop.eup %964 }
  0xf6   : > { %v544_v37 = vadd.f32 1.0, %v965_v36  ;;  %v967_v38 = vpop.eup %966 }
  0xf7   : > { %v745_v39 = vadd.f32 1.0, %v967_v38 }
  0xf8   : > { %968 = vrcp.f32 %v544_v37 }
  0xf9   : > { %970 = vrcp.f32 %v745_v39 }
 0x105   : > { %v969_v40 = vpop.eup %968 }
 0x106   : > { %v971_v43 = vpop.eup %970  ;;  %v552_v47 = vmul.f32 %v969_v40, %v550_v46 }
 0x107   : > { %v753_v51 = vmul.f32 %v971_v43, %v751_v48 }
 0x163   : > { %v555_v41 = vpop.permute.xlu0 %554 }
 0x164   : > { %v557_v42 = vmul.f32 %v969_v40, %v555_v41 }
 0x166   : > { %559 = vrot.lane.b32.xlu0 %v557_v42, %s987_s11 }
 0x167   : > { %v756_v44 = vpop.permute.xlu0 %755 }
 0x168   : > { %v758_v45 = vmul.f32 %v971_v43, %v756_v44 }
 0x16a   : > { %760 = vrot.lane.b32.xlu1 %v758_v45, %s987_s11 }
 0x1d8   : > { %v560_v49 = vpop.permute.xlu0 %559 }
 0x1d9   : > { %v562_v50 = vadd.f32 %v560_v49, %v552_v47 }
 0x1db   : > { %972 = vtanh.f32 %v562_v50 }
 0x1dc   : > { %v761_v52 = vpop.permute.xlu1 %760 }
 0x1dd   : > { %v763_v53 = vadd.f32 %v761_v52, %v753_v51 }
 0x1df   : > { %974 = vtanh.f32 %v763_v53 }
 0x1e8   : > { %v973_v54 = vpop.eup %972 }
 0x1e9   : > { %565 = vrot.lane.b32.xlu0 %v973_v54, %s988_s14 }
 0x1ec   : > { %v975_v55 = vpop.eup %974 }
 0x1ed   : > { %766 = vrot.lane.b32.xlu1 %v975_v55, %s988_s14 }
 0x1f1   : > { %575 = vrot.lane.b32.xlu1 %v562_v50, %s989_s15 }
 0x1f5   : > { %776 = vrot.lane.b32.xlu1 %v763_v53, %s989_s15 }
 0x25b   : > { %v566_v56 = vpop.permute.xlu0 %565 }
 0x25c   : > { %v568_v57 = vmul.f32 %v969_v40, %v566_v56 }
 0x25e   : > { %570 = vrot.lane.b32.xlu0 %v568_v57, %s987_s11 }
 0x25f   : > { %v767_v58 = vpop.permute.xlu1 %766 }
 0x260   : > { %v769_v59 = vmul.f32 %v971_v43, %v767_v58 }
 0x262   : > { %771 = vrot.lane.b32.xlu0 %v769_v59, %s987_s11 }
 0x263   : > { %v576_v60 = vpop.permute.xlu1 %575 }
 0x264   : > { %578 = vst.msk [vmem:[#allocation3] sm:$0xff] %vm385_vm3, %v576_v60 }
 0x267   : > { %v777_v61 = vpop.permute.xlu1 %776 }
 0x268   : > { %779 = vst.msk [vmem:[#allocation5] sm:$0xff] %vm385_vm3, %v777_v61 }
 0x2d0   : > { %v571_v62 = vpop.permute.xlu0 %570 }
 0x2d1   : > { %573 = vst.msk [vmem:[#allocation2] sm:$0xff] %vm385_vm3, %v571_v62  ;;  %579 = vst.msk [vmem:[%s1059_s23] sm:$0xff] %vm385_vm3, %v571_v62 }
 0x2d4   : > { %v772_v63 = vpop.permute.xlu0 %771 }
 0x2d5   : > { %774 = vst.msk [vmem:[#allocation4] sm:$0xff] %vm385_vm3, %v772_v63  ;;  %780 = vst.msk [vmem:[%s1064_s26] sm:$0xff] %vm385_vm3, %v772_v63 }
 0x2d6 PF: > { %s20_s30 = sadd.s32 1, %s982_s30  }
 0x2d7   : > { %p17_p6 = scmp.ge.s32.totalorder %s20_s30, 10  }
 0x2d9   :  { %19 = sbr.rel (!%p17_p6) target bundleno = 1 (0x1), region = 101 }

// kernel: stock_lstm_forward.4
= control target key start
LH: loop header
LB: loop body
LE: loop exit
PB: predicated region body
PF: predicated region fallthrough
CT: control target
= control target key end

     0   :  { %s1096_s30 = smov 0   ;;  %s1259_s0 = inlined_call_operand.vmem [shape: f32[8,8,64], index: 0, kind: input, shape index: {}, may-alias: {0,1}]   ;;  %s1260_s1 = inlined_call_operand.vmem [shape: f32[8,8,64], index: 1, kind: input, shape index: {}, may-alias: {0,1}]   ;;  %s1261_s2 = inlined_call_operand.vmem [shape: f32[64,128], index: 2, kind: input, shape index: {}]   ;;  %s1262_s3 = inlined_call_operand.vmem [shape: f32[32,128], index: 3, kind: input, shape index: {}]   ;;  %s1263_s4 = inlined_call_operand.vmem [shape: f32[1,128], index: 4, kind: input, shape index: {}]   ;;  %s1264_s5 = inlined_call_operand.vmem [shape: f32[64,128], index: 5, kind: input, shape index: {}]   ;;  %s1265_s6 = inlined_call_operand.vmem [shape: f32[32,128], index: 6, kind: input, shape index: {}]   ;;  %s1266_s7 = inlined_call_operand.vmem [shape: f32[1,128], index: 7, kind: input, shape index: {}]   ;;  %s1267_s8 = inlined_call_operand.vmem [shape: f32[8,8,32], index: 8, kind: output, shape index: {0}]   ;;  %s1268_s9 = inlined_call_operand.vmem [shape: f32[8,8,32], index: 9, kind: output, shape index: {1}]  }
   0x1 LB: > { %s894_s10 = sadd.s32 4294967295, %s1038_s30   ;;  %p898_p0 = scmp.ge.s32.totalorder %s1038_s30, 1  ;;  %s1038_s30 = sphi %s1096_s30, %s20_s30  }
   0x2   : > { %p304_p1 = scmp.lt.s32.totalorder %s1038_s30, 9 }
   0x4   : > { %p305_p2 = pnand %p898_p0, %p304_p1 }
   0x5   : > { %p348_p3 = scmp.lt.s32.totalorder (!%p305_p2), %s894_s10, 7  ;;  %s352_s11 = ssub.s32 (!%p305_p2), 7, %s894_s10 }
   0x6   : > { %308 = sbr.rel (%p305_p2) target bundleno = 744 (0x2e8), region = 52  ;;  %p353_p4 = scmp.lt.s32.totalorder (!%p305_p2), %s352_s11, 7 }
   0x7   : > { %p903_p5 = scmp.ne.s32.totalorder (!%p305_p2), %s894_s10, 0 }
   0xb   : > { %s349_s12 = scalar_select %p348_p3, %s894_s10, 7 }
   0xc   : > { %s1270_s11 = smov (!%p353_p4, %s352_s11), 7  ;;  %371 = sbr.rel (%p903_p5) target bundleno = 20 (0x14), region = 56 }
   0xd   : > { %s899_s13 = sshll.u32 %s349_s12, 3  ;;  %s900_s17 = sshll.u32 %s1270_s11, 3 }
   0xe   : > { %s1107_s16 = scalar_lea.vmem %s1259_s0, %s899_s13  ;;  %s1112_s20 = scalar_lea.vmem %s1260_s1, %s900_s17 }
   0xf   : > { %s1117_s23 = scalar_lea.vmem %s1267_s8, %s899_s13  ;;  %s1122_s26 = scalar_lea.vmem %s1268_s9, %s900_s17 }
  0x11   : > { %vm372_vm0 = vcmask 261120   ;;  %v1040_v0 = vmov 0.0  }
  0x12   : > { %373 = vst.msk [vmem:[#allocation2] sm:$0xff] %vm372_vm0, %v1040_v0  ;;  %374 = vst.msk [vmem:[#allocation3] sm:$0xff] %vm372_vm0, %v1040_v0 }
  0x13   : > { %375 = vst.msk [vmem:[#allocation4] sm:$0xff] %vm372_vm0, %v1040_v0  ;;  %376 = vst.msk [vmem:[#allocation5] sm:$0xff] %vm372_vm0, %v1040_v0 }
  0x14 PF: > { %v391_v1 = vld [vmem:[%s1262_s3 + $0x18] sm:$0xff]  ;;  %v1041_v3 = vmov 0.0   ;;  %v390_v4 = vld [vmem:[%s1262_s3 + $0x10] sm:$0xff]  ;;  %v389_v6 = vld [vmem:[%s1262_s3 + $0x8] sm:$0xff]  ;;  %vm392_vm1 = vcmask 261120   ;;  %vm1042_vm2 = vmmov 0  }
  0x15   : > { %v601_v2 = vld [vmem:[%s1265_s6 + $0x18] sm:$0xff]  ;;  %942 = vmatprep.subr.mxu1 %v1041_v3  ;;  %972 = vmatprep.subr.mxu0 %v1041_v3  ;;  %v600_v5 = vld [vmem:[%s1265_s6 + $0x10] sm:$0xff]  ;;  %v599_v7 = vld [vmem:[%s1265_s6 + $0x8] sm:$0xff]  ;;  %vm466_vm3 = vcmask 523264   ;;  %s1043_s27 = smov 32   ;;  %s1044_s11 = smov 64  }
  0x16   : > { %943 = vmatpush3.msra.mxu1 %v391_v1  ;;  %973 = vmatpush3.msra.mxu0 %v601_v2  ;;  %v388_v8 = vld [vmem:[%s1262_s3] sm:$0xff]  ;;  %v387_v11 = vld [vmem:[%s1261_s2 + $0x38] sm:$0xff]  ;;  %v386_v14 = vld [vmem:[%s1261_s2 + $0x30] sm:$0xff]  ;;  %s1045_s10 = smov 96  }
  0x17   : > { %944 = vmatprep.subr.mxu1 %v1041_v3  ;;  %974 = vmatprep.subr.mxu0 %v1041_v3  ;;  %v598_v9 = vld [vmem:[%s1265_s6] sm:$0xff]  ;;  %v597_v13 = vld [vmem:[%s1264_s5 + $0x38] sm:$0xff]  ;;  %v596_v15 = vld [vmem:[%s1264_s5 + $0x30] sm:$0xff] }
  0x18   : > { %945 = vmatpush3.msra.mxu1 %v390_v4  ;;  %975 = vmatpush3.msra.mxu0 %v600_v5  ;;  %v385_v16 = vld [vmem:[%s1261_s2 + $0x28] sm:$0xff]  ;;  %v384_v18 = vld [vmem:[%s1261_s2 + $0x20] sm:$0xff]  ;;  %v383_v20 = vld [vmem:[%s1261_s2 + $0x18] sm:$0xff] }
  0x19   : > { %946 = vmatprep.subr.mxu1 %v1041_v3  ;;  %976 = vmatprep.subr.mxu0 %v1041_v3  ;;  %v378_v10 = vld [vmem:[#allocation2] sm:$0xff]  ;;  %v595_v17 = vld [vmem:[%s1264_s5 + $0x28] sm:$0xff]  ;;  %v593_v21 = vld [vmem:[%s1264_s5 + $0x18] sm:$0xff] }
  0x1a   : > { %947 = vmatpush3.msra.mxu1 %v389_v6  ;;  %977 = vmatpush3.msra.mxu0 %v599_v7  ;;  %v588_v12 = vld [vmem:[#allocation4] sm:$0xff]  ;;  %v594_v19 = vld [vmem:[%s1264_s5 + $0x20] sm:$0xff]  ;;  %v381_v24 = vld [vmem:[%s1261_s2 + $0x8] sm:$0xff] }
  0x1b   : > { %948 = vmatprep.subr.mxu1 %v1041_v3  ;;  %978 = vmatprep.subr.mxu0 %v1041_v3  ;;  %v382_v22 = vld [vmem:[%s1261_s2 + $0x10] sm:$0xff]  ;;  %v591_v25 = vld [vmem:[%s1264_s5 + $0x8] sm:$0xff]  ;;  %v380_v26 = vld [vmem:[%s1261_s2] sm:$0xff] }
  0x1c   : > { %949 = vmatpush3.msra.mxu1 %v388_v8  ;;  %950 = vmatprep.mubr.msk.f32.mxu1 %vm1042_vm2, %v1041_v3  ;;  %v592_v23 = vld [vmem:[%s1264_s5 + $0x10] sm:$0xff]  ;;  %v590_v27 = vld [vmem:[%s1264_s5] sm:$0xff]  ;;  %v379_v30 = vld [vmem:[#allocation3] sm:$0xff] }
  0x1d   : > { %979 = vmatpush3.msra.mxu0 %v598_v9  ;;  %951 = vmatmul.mubr.msk.f32.vlgmr.msra.gmra.mxu1 %vm392_vm1, %v378_v10  ;;  %v377_v28 = vld [vmem:[%s1107_s16] sm:$0xff]  ;;  %v589_v31 = vld [vmem:[#allocation5] sm:$0xff] }
  0x1e   : > { %953 = vmatprep.subr.mxu1 %v1041_v3  ;;  %980 = vmatprep.mubr.msk.f32.mxu0 %vm1042_vm2, %v1041_v3  ;;  %v587_v29 = vld [vmem:[%s1112_s20] sm:$0xff] }
  0x1f   : > { %983 = vmatprep.subr.mxu0 %v1041_v3  ;;  %954 = vmatpush3.msra.mxu1 %v387_v11  ;;  %v906_v37 = vld [vmem:[%s1263_s4] ss:$0 sm:$0xff] }
  0x20   : > { %981 = vmatmul.mubr.msk.f32.vlgmr.msra.gmra.mxu0 %vm392_vm1, %v588_v12  ;;  %955 = vmatprep.subr.mxu1 %v1041_v3  ;;  %v910_v41 = vld [vmem:[%s1266_s7] ss:$0 sm:$0xff] }
  0x21   : > { %984 = vmatpush3.msra.mxu0 %v597_v13  ;;  %956 = vmatpush3.msra.mxu1 %v386_v14 }
  0x22   : > { %985 = vmatprep.subr.mxu0 %v1041_v3  ;;  %957 = vmatprep.subr.mxu1 %v1041_v3 }
  0x23   : > { %986 = vmatpush3.msra.mxu0 %v596_v15  ;;  %958 = vmatpush3.msra.mxu1 %v385_v16 }
  0x24   : > { %987 = vmatprep.subr.mxu0 %v1041_v3  ;;  %959 = vmatprep.subr.mxu1 %v1041_v3 }
  0x25   : > { %988 = vmatpush3.msra.mxu0 %v595_v17  ;;  %960 = vmatpush3.msra.mxu1 %v384_v18 }
  0x26   : > { %989 = vmatprep.subr.mxu0 %v1041_v3  ;;  %961 = vmatprep.subr.mxu1 %v1041_v3 }
  0x27   : > { %990 = vmatpush3.msra.mxu0 %v594_v19  ;;  %962 = vmatpush3.msra.mxu1 %v383_v20 }
  0x28   : > { %991 = vmatprep.subr.mxu0 %v1041_v3  ;;  %963 = vmatprep.subr.mxu1 %v1041_v3 }
  0x29   : > { %992 = vmatpush3.msra.mxu0 %v593_v21  ;;  %964 = vmatpush3.msra.mxu1 %v382_v22 }
  0x2a   : > { %993 = vmatprep.subr.mxu0 %v1041_v3  ;;  %965 = vmatprep.subr.mxu1 %v1041_v3 }
  0x2b   : > { %994 = vmatpush3.msra.mxu0 %v592_v23  ;;  %966 = vmatpush3.msra.mxu1 %v381_v24 }
  0x2c   : > { %995 = vmatprep.subr.mxu0 %v1041_v3  ;;  %967 = vmatprep.subr.mxu1 %v1041_v3 }
  0x2d   : > { %996 = vmatpush3.msra.mxu0 %v591_v25  ;;  %968 = vmatpush3.msra.mxu1 %v380_v26 }
  0x2e   : > { %997 = vmatprep.subr.mxu0 %v1041_v3  ;;  %969 = vmatprep.mubr.msk.f32.mxu1 %vm1042_vm2, %v1041_v3 }
  0x2f   : > { %998 = vmatpush3.msra.mxu0 %v590_v27  ;;  %999 = vmatprep.mubr.msk.f32.mxu0 %vm1042_vm2, %v1041_v3 }
  0x30   : > { %970 = vmatmul.mubr.msk.f32.vlgmr.msra.gmra.mxu1 %vm466_vm3, %v377_v28  ;;  %1000 = vmatmul.mubr.msk.f32.vlgmr.msra.gmra.mxu0 %vm466_vm3, %v587_v29 }
  0x31   : > { %556 = vrot.lane.b32.xlu1 %v379_v30, %s1043_s27 }
  0x35   : > { %764 = vrot.lane.b32.xlu1 %v589_v31, %s1043_s27 }
  0xa3   : > { %v557_v60 = vpop.permute.xlu1 %556 }
  0xa7   : > { %v765_v62 = vpop.permute.xlu1 %764 }
  0xdd   : > { %v462_v32 = vpop.f32.mrf.mxu1 }
  0xdf   : > { %v952_v33 = vpop.f32.mrf.mxu1 }
  0xe0   : > { %v671_v34 = vpop.f32.mrf.mxu0 }
  0xe2   : > { %v982_v35 = vpop.f32.mrf.mxu0 }
  0xf0   : > { %v536_v36 = vpop.f32.mrf.mxu1  ;;  %v744_v38 = vpop.f32.mrf.mxu0 }
  0xf1   : > { %v537_v39 = vadd.f32 %v536_v36, %v462_v32  ;;  %v745_v40 = vadd.f32 %v744_v38, %v671_v34 }
  0xf2   : > { %v971_v42 = vpop.f32.mrf.mxu1  ;;  %v1001_v43 = vpop.f32.mrf.mxu0 }
  0xf3   : > { %v547_v44 = vadd.f32 %v906_v37, %v537_v39  ;;  %v755_v45 = vadd.f32 %v910_v41, %v745_v40 }
  0xf5   : > { %1016 = vtanh.f32 %v547_v44  ;;  %v907_v48 = vmul.f32 -1.442695, %v547_v44  ;;  %v911_v49 = vmul.f32 -1.442695, %v755_v45 }
  0xf6   : > { %1018 = vtanh.f32 %v755_v45 }
  0xf7   : > { %1020 = vpow2.f32 %v907_v48 }
  0xf8   : > { %1022 = vpow2.f32 %v911_v49 }
 0x102   : > { %v1017_v46 = vpop.eup %1016 }
 0x103   : > { %561 = vrot.lane.b32.xlu0 %v1017_v46, %s1044_s11  ;;  %v1019_v47 = vpop.eup %1018 }
 0x104   : > { %v1021_v50 = vpop.eup %1020 }
 0x105   : > { %v551_v51 = vadd.f32 1.0, %v1021_v50  ;;  %v1023_v52 = vpop.eup %1022 }
 0x106   : > { %v759_v53 = vadd.f32 1.0, %v1023_v52 }
 0x107   : > { %769 = vrot.lane.b32.xlu0 %v1019_v47, %s1044_s11  ;;  %1024 = vrcp.f32 %v551_v51 }
 0x108   : > { %1026 = vrcp.f32 %v759_v53 }
 0x114   : > { %v1025_v54 = vpop.eup %1024 }
 0x115   : > { %v1027_v57 = vpop.eup %1026  ;;  %v559_v61 = vmul.f32 %v1025_v54, %v557_v60 }
 0x116   : > { %v767_v1 = vmul.f32 %v1027_v57, %v765_v62 }
 0x175   : > { %v562_v55 = vpop.permute.xlu0 %561 }
 0x176   : > { %v564_v56 = vmul.f32 %v1025_v54, %v562_v55 }
 0x178   : > { %566 = vrot.lane.b32.xlu0 %v564_v56, %s1043_s27 }
 0x179   : > { %v770_v58 = vpop.permute.xlu0 %769 }
 0x17a   : > { %v772_v59 = vmul.f32 %v1027_v57, %v770_v58 }
 0x17c   : > { %774 = vrot.lane.b32.xlu1 %v772_v59, %s1043_s27 }
 0x1ea   : > { %v567_v63 = vpop.permute.xlu0 %566 }
 0x1eb   : > { %v569_v0 = vadd.f32 %v567_v63, %v559_v61 }
 0x1ed   : > { %1028 = vtanh.f32 %v569_v0 }
 0x1ee   : > { %v775_v2 = vpop.permute.xlu1 %774 }
 0x1ef   : > { %v777_v3 = vadd.f32 %v775_v2, %v767_v1 }
 0x1f1   : > { %1030 = vtanh.f32 %v777_v3 }
 0x1fa   : > { %v1029_v4 = vpop.eup %1028 }
 0x1fb   : > { %572 = vrot.lane.b32.xlu0 %v1029_v4, %s1044_s11 }
 0x1fe   : > { %v1031_v5 = vpop.eup %1030 }
 0x1ff   : > { %780 = vrot.lane.b32.xlu1 %v1031_v5, %s1044_s11 }
 0x203   : > { %582 = vrot.lane.b32.xlu1 %v569_v0, %s1045_s10 }
 0x207   : > { %790 = vrot.lane.b32.xlu1 %v777_v3, %s1045_s10 }
 0x26d   : > { %v573_v6 = vpop.permute.xlu0 %572 }
 0x26e   : > { %v575_v7 = vmul.f32 %v1025_v54, %v573_v6 }
 0x270   : > { %577 = vrot.lane.b32.xlu0 %v575_v7, %s1043_s27 }
 0x271   : > { %v781_v8 = vpop.permute.xlu1 %780 }
 0x272   : > { %v783_v9 = vmul.f32 %v1027_v57, %v781_v8 }
 0x274   : > { %785 = vrot.lane.b32.xlu0 %v783_v9, %s1043_s27 }
 0x275   : > { %v583_v10 = vpop.permute.xlu1 %582 }
 0x276   : > { %585 = vst.msk [vmem:[#allocation3] sm:$0xff] %vm392_vm1, %v583_v10 }
 0x279   : > { %v791_v11 = vpop.permute.xlu1 %790 }
 0x27a   : > { %793 = vst.msk [vmem:[#allocation5] sm:$0xff] %vm392_vm1, %v791_v11 }
 0x2e2   : > { %v578_v12 = vpop.permute.xlu0 %577 }
 0x2e3   : > { %580 = vst.msk [vmem:[#allocation2] sm:$0xff] %vm392_vm1, %v578_v12  ;;  %586 = vst.msk [vmem:[%s1117_s23] sm:$0xff] %vm392_vm1, %v578_v12 }
 0x2e6   : > { %v786_v13 = vpop.permute.xlu0 %785 }
 0x2e7   : > { %788 = vst.msk [vmem:[#allocation4] sm:$0xff] %vm392_vm1, %v786_v13  ;;  %794 = vst.msk [vmem:[%s1122_s26] sm:$0xff] %vm392_vm1, %v786_v13 }
 0x2e8 PF: > { %s20_s30 = sadd.s32 1, %s1038_s30  }
 0x2e9   : > { %p17_p6 = scmp.ge.s32.totalorder %s20_s30, 10  }
 0x2eb   :  { %19 = sbr.rel (!%p17_p6) target bundleno = 1 (0x1), region = 101 }

</bundles_post_ra>
